<compile_context>
chip_gen: v7x
topology: tpu7x:2x2x1
jax: 0.10.0
libtpu: 0.0.40
codegen_flags: <defaults>
</compile_context>

<pallas_src>
import jax
import jax.numpy as jnp
from jax.experimental import pallas as pl
from jax.experimental.pallas import tpu as pltpu


# ----------------------------------------------------------------------------
# Single fused kernel: 3x3 conv (one K=27 matmul) + bias + SiLU + GAP + FC head
# One grid step per image; all weights resident, all outputs lane-dense (128).
# ----------------------------------------------------------------------------
def fused_forward_kernel(x_ref, wc_ref, bc_ref, w1_ref, b1_ref, w2_ref, b2_ref,
                         out_ref):
    # x_ref  : (1, H+2, W+2, Cin)   spatially padded NHWC image
    # wc_ref : (9*Cin, CP)          3x3 conv weights, lane-padded Cout -> CP
    # bc_ref : (1, CP)
    # w1_ref : (CP, HP)             FC1 (lane-padded)
    # b1_ref : (1, HP)
    # w2_ref : (HP, NCP)            FC2 / classifier (lane-padded)
    # b2_ref : (1, NCP)
    # out_ref: (1, 1, NCP)          lane-dense logits slab for this image
    hp2, wp2, cin = x_ref.shape[1], x_ref.shape[2], x_ref.shape[3]
    H, W = hp2 - 2, wp2 - 2
    hw = H * W

    # 9 shifted views of the padded image, formed in-kernel (no HBM im2col).
    taps = [
        x_ref[0, ky:ky + H, kx:kx + W, :]          # (H, W, Cin) each
        for ky in range(3) for kx in range(3)
    ]
    patches = jnp.concatenate(taps, axis=-1)       # (H, W, 9*Cin)
    patches = patches.reshape(hw, 9 * cin)         # (H*W, 27)

    # Conv stem as a single MXU matmul with K = 9*Cin.
    acc = jnp.dot(patches, wc_ref[...], preferred_element_type=jnp.float32)
    acc = acc + bc_ref[...]
    acc = acc * jax.nn.sigmoid(acc)                # SiLU (BN folded)

    # Global average pool as scaled sum (constant reciprocal, off the VALU).
    pooled = acc.sum(axis=0, keepdims=True) * (1.0 / hw)   # (1, CP)

    # FC head: Linear -> ReLU -> Dropout(p=0.2, identity @ inference) -> Linear
    h = jnp.dot(pooled, w1_ref[...], preferred_element_type=jnp.float32)
    h = jnp.maximum(h + b1_ref[...], 0.0)
    logits = jnp.dot(h, w2_ref[...], preferred_element_type=jnp.float32)
    out_ref[0] = logits + b2_ref[...]


# ----------------------------------------------------------------------------
# Parameters (synthetic stand-in for the checkpoint)
# ----------------------------------------------------------------------------
def init_params(key, cin=3, cout=32, hidden=32, num_classes=8):
    ks = jax.random.split(key, 6)
    scale = lambda fan_in: 1.0 / jnp.sqrt(jnp.float32(fan_in))
    return {
        "w_conv": jax.random.normal(ks[0], (9, cin, cout), jnp.float32) * scale(9 * cin),
        "b_conv": jax.random.normal(ks[1], (1, cout), jnp.float32) * 0.01,
        "w1": jax.random.normal(ks[2], (cout, hidden), jnp.float32) * scale(cout),
        "b1": jax.random.normal(ks[3], (1, hidden), jnp.float32) * 0.01,
        "w2": jax.random.normal(ks[4], (hidden, num_classes), jnp.float32) * scale(hidden),
        "b2": jax.random.normal(ks[5], (1, num_classes), jnp.float32) * 0.01,
    }


def _lane_pad(n, lanes=128):
    return pl.cdiv(n, lanes) * lanes


# ----------------------------------------------------------------------------
# Wrapper / glue
# ----------------------------------------------------------------------------
def torch_inference_forward(x_nchw, params):
    """Equivalent of TorchInferenceModel.forward: returns (label, logits)."""
    B, Cin, H, W = x_nchw.shape
    Cout = params["w_conv"].shape[-1]
    hidden = params["w1"].shape[-1]
    num_classes = params["w2"].shape[-1]

    # Lane-padded channel dims so every in-kernel vreg / store is 128-lane dense.
    CP = _lane_pad(Cout)
    HP = _lane_pad(hidden)
    NCP = _lane_pad(num_classes)

    # ---- glue: NCHW -> NHWC + spatial pad for 3x3 / pad=1 (no im2col) -------
    x = jnp.transpose(x_nchw, (0, 2, 3, 1)).astype(jnp.float32)       # (B,H,W,Cin)
    xp = jnp.pad(x, ((0, 0), (1, 1), (1, 1), (0, 0)))                 # (B,H+2,W+2,Cin)

    # ---- glue: zero-pad weights to lane-dense widths -------------------------
    f32 = jnp.float32
    wc = params["w_conv"].reshape(9 * Cin, Cout)
    wc_p = jnp.zeros((9 * Cin, CP), f32).at[:, :Cout].set(wc)
    bc_p = jnp.zeros((1, CP), f32).at[:, :Cout].set(params["b_conv"])
    w1_p = jnp.zeros((CP, HP), f32).at[:Cout, :hidden].set(params["w1"])
    b1_p = jnp.zeros((1, HP), f32).at[:, :hidden].set(params["b1"])
    w2_p = jnp.zeros((HP, NCP), f32).at[:hidden, :num_classes].set(params["w2"])
    b2_p = jnp.zeros((1, NCP), f32).at[:, :num_classes].set(params["b2"])

    # ---- single fused Pallas kernel: conv + SiLU + GAP + FC head -------------
    logits_p = pl.pallas_call(
        fused_forward_kernel,
        out_shape=jax.ShapeDtypeStruct((B, 1, NCP), jnp.float32),
        grid=(B,),
        in_specs=[
            pl.BlockSpec((1, H + 2, W + 2, Cin), lambda b: (b, 0, 0, 0)),
            pl.BlockSpec((9 * Cin, CP), lambda b: (0, 0)),
            pl.BlockSpec((1, CP), lambda b: (0, 0)),
            pl.BlockSpec((CP, HP), lambda b: (0, 0)),
            pl.BlockSpec((1, HP), lambda b: (0, 0)),
            pl.BlockSpec((HP, NCP), lambda b: (0, 0)),
            pl.BlockSpec((1, NCP), lambda b: (0, 0)),
        ],
        out_specs=pl.BlockSpec((1, 1, NCP), lambda b: (b, 0, 0)),
        compiler_params=pltpu.CompilerParams(
            dimension_semantics=("parallel",),
            vmem_limit_bytes=32 * 1024 * 1024,
        ),
    )(xp, wc_p, bc_p, w1_p, b1_p, w2_p, b2_p)

    # ---- glue: drop lane padding, map_prediction_to_class (argmax) ----------
    logits = logits_p.reshape(B, NCP)[:, :num_classes]
    label = jnp.argmax(logits, axis=-1)
    return label, logits


if __name__ == "__main__":
    key = jax.random.PRNGKey(0)
    k_param, k_data = jax.random.split(key)

    params = init_params(k_param, cin=3, cout=32, hidden=32, num_classes=8)
    x = jax.random.normal(k_data, (2, 3, 16, 16), jnp.float32)  # NCHW like PyTorch

    fwd = jax.jit(torch_inference_forward)
    label, logits = fwd(x, params)
    jax.block_until_ready((label, logits))

    assert label.shape == (2,) and logits.shape == (2, 8)
    print("KERNEL_OK")
</pallas_src>

<mosaic_0001>
module attributes {stable_mosaic.version = 11 : i64} {
  func.func @fused_forward_kernel(%arg0: i32, %arg1: memref<1x18x18x3xf32, #tpu.memory_space<vmem>>, %arg2: memref<27x128xf32, #tpu.memory_space<vmem>>, %arg3: memref<1x128xf32, #tpu.memory_space<vmem>>, %arg4: memref<128x128xf32, #tpu.memory_space<vmem>>, %arg5: memref<1x128xf32, #tpu.memory_space<vmem>>, %arg6: memref<128x128xf32, #tpu.memory_space<vmem>>, %arg7: memref<1x128xf32, #tpu.memory_space<vmem>>, %arg8: memref<1x1x128xf32, #tpu.memory_space<vmem>>) attributes {dimension_semantics = [#tpu.dimension_semantics<parallel>], iteration_bounds = array<i64: 2>, scalar_prefetch = 0 : i64, scratch_operands = 0 : i64, tpu.core_type = #tpu.core_type<tc>, window_params = [{transform_indices = @transform_0, window_bounds = array<i64: 1, 18, 18, 3>}, {pipeline_mode = #tpu.pipeline_mode<synchronous>, transform_indices = @transform_1, window_bounds = array<i64: 27, 128>}, {pipeline_mode = #tpu.pipeline_mode<synchronous>, transform_indices = @transform_2, window_bounds = array<i64: 1, 128>}, {pipeline_mode = #tpu.pipeline_mode<synchronous>, transform_indices = @transform_3, window_bounds = array<i64: 128, 128>}, {pipeline_mode = #tpu.pipeline_mode<synchronous>, transform_indices = @transform_4, window_bounds = array<i64: 1, 128>}, {pipeline_mode = #tpu.pipeline_mode<synchronous>, transform_indices = @transform_5, window_bounds = array<i64: 128, 128>}, {pipeline_mode = #tpu.pipeline_mode<synchronous>, transform_indices = @transform_6, window_bounds = array<i64: 1, 128>}, {transform_indices = @transform_7, window_bounds = array<i64: 1, 1, 128>}]} {
    %c0 = arith.constant 0 : index
    %c0_0 = arith.constant 0 : index
    %c0_1 = arith.constant 0 : index
    %c0_2 = arith.constant 0 : index
    %0 = vector.load %arg1[%c0, %c0_0, %c0_1, %c0_2] : memref<1x18x18x3xf32, #tpu.memory_space<vmem>>, vector<1x16x16x3xf32>
    %1 = vector.shape_cast %0 : vector<1x16x16x3xf32> to vector<16x16x3xf32>
    %c0_3 = arith.constant 0 : index
    %c0_4 = arith.constant 0 : index
    %c1 = arith.constant 1 : index
    %c0_5 = arith.constant 0 : index
    %2 = vector.load %arg1[%c0_3, %c0_4, %c1, %c0_5] : memref<1x18x18x3xf32, #tpu.memory_space<vmem>>, vector<1x16x16x3xf32>
    %3 = vector.shape_cast %2 : vector<1x16x16x3xf32> to vector<16x16x3xf32>
    %c0_6 = arith.constant 0 : index
    %c0_7 = arith.constant 0 : index
    %c2 = arith.constant 2 : index
    %c0_8 = arith.constant 0 : index
    %4 = vector.load %arg1[%c0_6, %c0_7, %c2, %c0_8] : memref<1x18x18x3xf32, #tpu.memory_space<vmem>>, vector<1x16x16x3xf32>
    %5 = vector.shape_cast %4 : vector<1x16x16x3xf32> to vector<16x16x3xf32>
    %c0_9 = arith.constant 0 : index
    %c1_10 = arith.constant 1 : index
    %c0_11 = arith.constant 0 : index
    %c0_12 = arith.constant 0 : index
    %6 = vector.load %arg1[%c0_9, %c1_10, %c0_11, %c0_12] : memref<1x18x18x3xf32, #tpu.memory_space<vmem>>, vector<1x16x16x3xf32>
    %7 = vector.shape_cast %6 : vector<1x16x16x3xf32> to vector<16x16x3xf32>
    %c0_13 = arith.constant 0 : index
    %c1_14 = arith.constant 1 : index
    %c1_15 = arith.constant 1 : index
    %c0_16 = arith.constant 0 : index
    %8 = vector.load %arg1[%c0_13, %c1_14, %c1_15, %c0_16] : memref<1x18x18x3xf32, #tpu.memory_space<vmem>>, vector<1x16x16x3xf32>
    %9 = vector.shape_cast %8 : vector<1x16x16x3xf32> to vector<16x16x3xf32>
    %c0_17 = arith.constant 0 : index
    %c1_18 = arith.constant 1 : index
    %c2_19 = arith.constant 2 : index
    %c0_20 = arith.constant 0 : index
    %10 = vector.load %arg1[%c0_17, %c1_18, %c2_19, %c0_20] : memref<1x18x18x3xf32, #tpu.memory_space<vmem>>, vector<1x16x16x3xf32>
    %11 = vector.shape_cast %10 : vector<1x16x16x3xf32> to vector<16x16x3xf32>
    %c0_21 = arith.constant 0 : index
    %c2_22 = arith.constant 2 : index
    %c0_23 = arith.constant 0 : index
    %c0_24 = arith.constant 0 : index
    %12 = vector.load %arg1[%c0_21, %c2_22, %c0_23, %c0_24] : memref<1x18x18x3xf32, #tpu.memory_space<vmem>>, vector<1x16x16x3xf32>
    %13 = vector.shape_cast %12 : vector<1x16x16x3xf32> to vector<16x16x3xf32>
    %c0_25 = arith.constant 0 : index
    %c2_26 = arith.constant 2 : index
    %c1_27 = arith.constant 1 : index
    %c0_28 = arith.constant 0 : index
    %14 = vector.load %arg1[%c0_25, %c2_26, %c1_27, %c0_28] : memref<1x18x18x3xf32, #tpu.memory_space<vmem>>, vector<1x16x16x3xf32>
    %15 = vector.shape_cast %14 : vector<1x16x16x3xf32> to vector<16x16x3xf32>
    %c0_29 = arith.constant 0 : index
    %c2_30 = arith.constant 2 : index
    %c2_31 = arith.constant 2 : index
    %c0_32 = arith.constant 0 : index
    %16 = vector.load %arg1[%c0_29, %c2_30, %c2_31, %c0_32] : memref<1x18x18x3xf32, #tpu.memory_space<vmem>>, vector<1x16x16x3xf32>
    %17 = vector.shape_cast %16 : vector<1x16x16x3xf32> to vector<16x16x3xf32>
    %18 = tpu.concatenate %1, %3, %5, %7, %9, %11, %13, %15, %17 in 2 : vector<16x16x3xf32>, vector<16x16x3xf32>, vector<16x16x3xf32>, vector<16x16x3xf32>, vector<16x16x3xf32>, vector<16x16x3xf32>, vector<16x16x3xf32>, vector<16x16x3xf32>, vector<16x16x3xf32> -> vector<16x16x27xf32>
    %19 = vector.shape_cast %18 : vector<16x16x27xf32> to vector<256x27xf32>
    %c0_33 = arith.constant 0 : index
    %c0_34 = arith.constant 0 : index
    %20 = vector.load %arg2[%c0_33, %c0_34] : memref<27x128xf32, #tpu.memory_space<vmem>>, vector<27x128xf32>
    %cst = arith.constant dense<0.000000e+00> : vector<256x128xf32>
    %21 = tpu.matmul %19, %20, %cst {dimension_numbers = #tpu.dot_dimension_numbers<[1], [0], [0], [1], [0, 0, 1, 1], [], []>} : vector<256x27xf32>, vector<27x128xf32>, vector<256x128xf32> -> vector<256x128xf32>
    %c0_35 = arith.constant 0 : index
    %c0_36 = arith.constant 0 : index
    %22 = vector.load %arg3[%c0_35, %c0_36] : memref<1x128xf32, #tpu.memory_space<vmem>>, vector<1x128xf32>
    %23 = vector.broadcast %22 : vector<1x128xf32> to vector<256x128xf32>
    %24 = arith.addf %21, %23 : vector<256x128xf32>
    %25 = arith.negf %24 : vector<256x128xf32>
    %26 = math.exp %25 : vector<256x128xf32>
    %cst_37 = arith.constant 1.000000e+00 : f32
    %27 = vector.broadcast %cst_37 : f32 to vector<256x128xf32>
    %28 = arith.addf %27, %26 : vector<256x128xf32>
    %29 = arith.divf %27, %28 : vector<256x128xf32>
    %30 = arith.mulf %24, %29 : vector<256x128xf32>
    %cst_38 = arith.constant dense<0.000000e+00> : vector<128xf32>
    %31 = vector.multi_reduction <add>, %30, %cst_38 [0] : vector<256x128xf32> to vector<128xf32>
    %32 = vector.shape_cast %31 : vector<128xf32> to vector<1x128xf32>
    %cst_39 = arith.constant 3.906250e-03 : f32
    %33 = vector.broadcast %cst_39 : f32 to vector<1x128xf32>
    %34 = arith.mulf %32, %33 : vector<1x128xf32>
    %c0_40 = arith.constant 0 : index
    %c0_41 = arith.constant 0 : index
    %35 = vector.load %arg4[%c0_40, %c0_41] : memref<128x128xf32, #tpu.memory_space<vmem>>, vector<128x128xf32>
    %cst_42 = arith.constant dense<0.000000e+00> : vector<1x128xf32>
    %36 = tpu.matmul %34, %35, %cst_42 {dimension_numbers = #tpu.dot_dimension_numbers<[1], [0], [0], [1], [0, 0, 1, 1], [], []>} : vector<1x128xf32>, vector<128x128xf32>, vector<1x128xf32> -> vector<1x128xf32>
    %c0_43 = arith.constant 0 : index
    %c0_44 = arith.constant 0 : index
    %37 = vector.load %arg5[%c0_43, %c0_44] : memref<1x128xf32, #tpu.memory_space<vmem>>, vector<1x128xf32>
    %38 = arith.addf %36, %37 : vector<1x128xf32>
    %cst_45 = arith.constant 0.000000e+00 : f32
    %39 = vector.broadcast %cst_45 : f32 to vector<1x128xf32>
    %40 = arith.maximumf %38, %39 : vector<1x128xf32>
    %c0_46 = arith.constant 0 : index
    %c0_47 = arith.constant 0 : index
    %41 = vector.load %arg6[%c0_46, %c0_47] : memref<128x128xf32, #tpu.memory_space<vmem>>, vector<128x128xf32>
    %cst_48 = arith.constant dense<0.000000e+00> : vector<1x128xf32>
    %42 = tpu.matmul %40, %41, %cst_48 {dimension_numbers = #tpu.dot_dimension_numbers<[1], [0], [0], [1], [0, 0, 1, 1], [], []>} : vector<1x128xf32>, vector<128x128xf32>, vector<1x128xf32> -> vector<1x128xf32>
    %c0_49 = arith.constant 0 : index
    %c0_50 = arith.constant 0 : index
    %43 = vector.load %arg7[%c0_49, %c0_50] : memref<1x128xf32, #tpu.memory_space<vmem>>, vector<1x128xf32>
    %44 = arith.addf %42, %43 : vector<1x128xf32>
    %c0_51 = arith.constant 0 : index
    %c0_52 = arith.constant 0 : index
    %c0_53 = arith.constant 0 : index
    %45 = vector.load %arg8[%c0_51, %c0_52, %c0_53] : memref<1x1x128xf32, #tpu.memory_space<vmem>>, vector<1x1x128xf32>
    %46 = vector.shape_cast %45 : vector<1x1x128xf32> to vector<1x128xf32>
    %47 = vector.shape_cast %44 : vector<1x128xf32> to vector<1x1x128xf32>
    tpu.vector_store %arg8[%c0_51, %c0_52, %c0_53], %47 {strides = array<i32>} : memref<1x1x128xf32, #tpu.memory_space<vmem>>, vector<1x1x128xf32>,
    return
  }
  func.func @transform_0(%arg0: i32) -> (i32, i32, i32, i32) {
    %c0_i32 = arith.constant 0 : i32
    %c0_i32_0 = arith.constant 0 : i32
    %c0_i32_1 = arith.constant 0 : i32
    %c0_i32_2 = arith.constant 0 : i32
    return %arg0, %c0_i32, %c0_i32_0, %c0_i32_1 : i32, i32, i32, i32
  }
  func.func @transform_1(%arg0: i32) -> (i32, i32) {
    %c0_i32 = arith.constant 0 : i32
    %c0_i32_0 = arith.constant 0 : i32
    %c0_i32_1 = arith.constant 0 : i32
    return %c0_i32, %c0_i32_0 : i32, i32
  }
  func.func @transform_2(%arg0: i32) -> (i32, i32) {
    %c0_i32 = arith.constant 0 : i32
    %c0_i32_0 = arith.constant 0 : i32
    %c0_i32_1 = arith.constant 0 : i32
    return %c0_i32, %c0_i32_0 : i32, i32
  }
  func.func @transform_3(%arg0: i32) -> (i32, i32) {
    %c0_i32 = arith.constant 0 : i32
    %c0_i32_0 = arith.constant 0 : i32
    %c0_i32_1 = arith.constant 0 : i32
    return %c0_i32, %c0_i32_0 : i32, i32
  }
  func.func @transform_4(%arg0: i32) -> (i32, i32) {
    %c0_i32 = arith.constant 0 : i32
    %c0_i32_0 = arith.constant 0 : i32
    %c0_i32_1 = arith.constant 0 : i32
    return %c0_i32, %c0_i32_0 : i32, i32
  }
  func.func @transform_5(%arg0: i32) -> (i32, i32) {
    %c0_i32 = arith.constant 0 : i32
    %c0_i32_0 = arith.constant 0 : i32
    %c0_i32_1 = arith.constant 0 : i32
    return %c0_i32, %c0_i32_0 : i32, i32
  }
  func.func @transform_6(%arg0: i32) -> (i32, i32) {
    %c0_i32 = arith.constant 0 : i32
    %c0_i32_0 = arith.constant 0 : i32
    %c0_i32_1 = arith.constant 0 : i32
    return %c0_i32, %c0_i32_0 : i32, i32
  }
  func.func @transform_7(%arg0: i32) -> (i32, i32, i32) {
    %c0_i32 = arith.constant 0 : i32
    %c0_i32_0 = arith.constant 0 : i32
    %c0_i32_1 = arith.constant 0 : i32
    return %arg0, %c0_i32, %c0_i32_0 : i32, i32, i32
  }
}

</mosaic_0001>

<bundles_post_ra>
// kernel: torch_inference_forward.1
= control target key start
LH: loop header
LB: loop body
LE: loop exit
PB: predicated region body
PF: predicated region fallthrough
CT: control target
= control target key end

     0   :  { %s3405_s24 = smov 0   ;;  %s4735_s0 = inlined_call_operand.vmem [shape: f32[2,18,18,3], index: 0, kind: input, shape index: {}]   ;;  %s4736_s1 = inlined_call_operand.vmem [shape: f32[27,128], index: 1, kind: input, shape index: {}]   ;;  %s4737_s2 = inlined_call_operand.vmem [shape: f32[1,128], index: 2, kind: input, shape index: {}]   ;;  %s4738_s3 = inlined_call_operand.vmem [shape: f32[128,128], index: 3, kind: input, shape index: {}]   ;;  %s4739_s4 = inlined_call_operand.vmem [shape: f32[1,128], index: 4, kind: input, shape index: {}]   ;;  %s4740_s5 = inlined_call_operand.vmem [shape: f32[128,128], index: 5, kind: input, shape index: {}]   ;;  %s4741_s6 = inlined_call_operand.vmem [shape: f32[1,128], index: 6, kind: input, shape index: {}]   ;;  %s4742_s7 = inlined_call_operand.vmem [shape: f32[2,1,128], index: 7, kind: output, shape index: {}]  }
   0x1 LB: > { %s2675_s25 = sadd.s32 4294967295, %s3351_s24   ;;  %p2679_p0 = scmp.ge.s32.totalorder %s3351_s24, 1  ;;  %s3351_s24 = sphi %s3405_s24, %s17_s24  }
   0x2   : > { %p237_p1 = scmp.lt.s32.totalorder %s3351_s24, 3 }
   0x4   : > { %p238_p2 = pnand %p2679_p0, %p237_p1 }
   0x5   : > { %p267_p3 = scmp.lt.s32.totalorder (!%p238_p2), %s2675_s25, 1  ;;  %s3353_s30 = smov (!%p238_p2), 6   ;;  %v1853_v11 = vld [vmem:[%s4736_s1] sm:$0xff] (!%p238_p2)  ;;  %v1854_v12 = vld [vmem:[%s4736_s1 + $0x8] sm:$0xff] (!%p238_p2)  ;;  %v1855_v16 = vld [vmem:[%s4736_s1 + $0x10] sm:$0xff] (!%p238_p2)  ;;  %vm1961_vm0 = vcmask (!%p238_p2), 1042432  }
   0x6   : > { %241 = sbr.rel (%p238_p2) target bundleno = 1338 (0x53a), region = 48  ;;  %s3354_s8 = smov (!%p238_p2), 3   ;;  %v3137_v13 = vpack.c.bf16 (!%p238_p2), %v1854_v12, %v1853_v11  ;;  %v1856_v17 = vld [vmem:[%s4736_s1 + $0x18] sm:$0x7] (!%p238_p2)  ;;  %vm3360_vm1 = vmmov (!%p238_p2), 1   ;;  %vm1589_vm3 = vcmask (!%p238_p2), 23552  }
   0x7   : > { %s3355_s9 = smov (!%p238_p2), 9   ;;  %s3356_s10 = smov (!%p238_p2), 12   ;;  %v3141_v18 = vpack.c.bf16 (!%p238_p2), %v1856_v17, %v1855_v16  ;;  %vm3142_vm2 = vmpackc.low (!%p238_p2), %vm1961_vm0, %vm3360_vm1  ;;  %vm1622_vm4 = vcmask (!%p238_p2), 48128   ;;  %vm1655_vm5 = vcmask (!%p238_p2), 72704   ;;  %vm1688_vm6 = vcmask (!%p238_p2), 97280  }
   0x8   : > { %s3357_s11 = smov (!%p238_p2), 15   ;;  %s3358_s12 = smov (!%p238_p2), 18   ;;  %3138 = vmatprep.subr.bf16.mxu0 (!%p238_p2), %v3137_v13  ;;  %vm1721_vm7 = vcmask (!%p238_p2), 121856   ;;  %vm1754_vm8 = vcmask (!%p238_p2), 146432   ;;  %vm1787_vm9 = vcmask (!%p238_p2), 171008   ;;  %vm1820_vm10 = vcmask (!%p238_p2), 195584  }
   0x9   : > { %3140 = vmatpush3.bf16.msra.mxu0 (!%p238_p2), %v3137_v13  ;;  %s3359_s21 = smov (!%p238_p2), 21   ;;  %s3361_s22 = smov (!%p238_p2), 24   ;;  %vm1864_vm11 = vcmask (!%p238_p2), 220160   ;;  %vm3363_vm12 = vmmov (!%p238_p2), 0  }
   0xa   : > { %3143 = vmatprep.subr.msk.bf16.mxu0 (!%p238_p2), %vm3142_vm2, %v3141_v18 }
   0xd   : > { %s4744_s25 = smov (!%p267_p3, %s2675_s25), 1  ;;  %3146 = vmatpush3.bf16.msk.msra.mxu0 %vm3142_vm2, %v3141_v18 }
   0xe   : > { %s3195_s26 = smul.u32 432, %s4744_s25  ;;  %s274_s13 = scalar_lea.vmem %s4742_s7, %s4744_s25 }
  0x10   : > { %s3419_s29 = scalar_lea.vmem %s4735_s0, %s3195_s26 }
  0x11   : > { %v339_v0 = vld [vmem:[%s3419_s29 + $0x2] sm:$0xff]  ;;  %v340_v2 = vld [vmem:[%s3419_s29 + $0xa] sm:$0xff]  ;;  %v3433_v5 = vld [vmem:[%s3419_s29 + $0x18] sm:$0xff] }
  0x12   : > { %v307_v1 = vld [vmem:[%s3419_s29 + $0x1] sm:$0xff]  ;;  %725 = vrot.lane.b32.xlu1 %v339_v0, %s3353_s30  ;;  %v308_v3 = vld [vmem:[%s3419_s29 + $0x9] sm:$0xff]  ;;  %v309_v6 = vld [vmem:[%s3419_s29 + $0x19] sm:$0xff] }
  0x13   : > { %597 = vrot.lane.b32.xlu0 %v307_v1, %s3354_s8  ;;  %v3430_v4 = vld [vmem:[%s3419_s29 + $0x20] sm:$0xff]  ;;  %v3449_v9 = vld [vmem:[%s3419_s29 + $0x30] sm:$0xff]  ;;  %v3466_v15 = vld [vmem:[%s3419_s29 + $0x38] sm:$0xff] }
  0x14   : > { %v2745_v7 = vld [vmem:[%s3419_s29 + $0x1a] sm:$0xff]  ;;  %v2746_v10 = vld [vmem:[%s3419_s29 + $0x22] sm:$0xff]  ;;  %v2809_v14 = vld [vmem:[%s3419_s29 + $0x31] sm:$0xff] }
  0x15   : > { %v2714_v8 = vld [vmem:[%s3419_s29 + $0x21] sm:$0xff]  ;;  %v2841_v19 = vld [vmem:[%s3419_s29 + $0x32] sm:$0xff]  ;;  %v2811_v23 = vld [vmem:[%s3419_s29 + $0x49] sm:$0xff] }
  0x16   : > { %727 = vrot.lane.b32.xlu1 %v340_v2, %s3353_s30  ;;  %v2810_v20 = vld [vmem:[%s3419_s29 + $0x39] sm:$0xff]  ;;  %v3492_v22 = vld [vmem:[%s3419_s29 + $0x48] sm:$0xff]  ;;  %v3502_v24 = vld [vmem:[%s3419_s29 + $0x50] sm:$0xff] }
  0x17   : > { %599 = vrot.lane.b32.xlu0 %v308_v3, %s3354_s8  ;;  %v2842_v21 = vld [vmem:[%s3419_s29 + $0x3a] sm:$0xff]  ;;  %v2843_v25 = vld [vmem:[%s3419_s29 + $0x4a] sm:$0xff]  ;;  %v2844_v27 = vld [vmem:[%s3419_s29 + $0x52] sm:$0xff] }
  0x18   : > { %v2812_v26 = vld [vmem:[%s3419_s29 + $0x51] sm:$0xff]  ;;  %v3522_v28 = vld [vmem:[%s3419_s29 + $0x60] sm:$0xff]  ;;  %v3532_v30 = vld [vmem:[%s3419_s29 + $0x68] sm:$0xff] }
  0x19   : > { %v2813_v29 = vld [vmem:[%s3419_s29 + $0x61] sm:$0xff]  ;;  %v2814_v32 = vld [vmem:[%s3419_s29 + $0x69] sm:$0xff]  ;;  %v3552_v36 = vld [vmem:[%s3419_s29 + $0x78] sm:$0xff] }
  0x1a   : > { %855 = vrot.lane.b32.xlu1 %v3430_v4, %s3355_s9  ;;  %v2845_v31 = vld [vmem:[%s3419_s29 + $0x62] sm:$0xff]  ;;  %v2846_v33 = vld [vmem:[%s3419_s29 + $0x6a] sm:$0xff]  ;;  %v2815_v41 = vld [vmem:[%s3419_s29 + $0x79] sm:$0xff] }
  0x1b   : > { %853 = vrot.lane.b32.xlu0 %v3433_v5, %s3355_s9  ;;  %v3566_v42 = vld [vmem:[%s3419_s29 + $0x80] sm:$0xff]  ;;  %v3599_v61 = vld [vmem:[%s3419_s29 + $0x90] sm:$0xff]  ;;  %v276_v1 = vld [vmem:[%s3419_s29 + $0x8] sm:$0xff] }
  0x1c   : > { %v2847_v47 = vld [vmem:[%s3419_s29 + $0x7a] sm:$0xff]  ;;  %v2848_v53 = vld [vmem:[%s3419_s29 + $0x82] sm:$0xff] }
  0x1d   : > { %v2816_v48 = vld [vmem:[%s3419_s29 + $0x81] sm:$0xff]  ;;  %v3624_v16 = vld [vmem:[%s3419_s29 + $0x98] sm:$0xff] }
  0x1e   : > { %601 = vrot.lane.b32.xlu1 %v309_v6, %s3354_s8  ;;  %v275_v56 = vld [vmem:[%s3419_s29] sm:$0xff] }
  0x1f   : > { %981 = vrot.lane.b32.xlu0 %v309_v6, %s3356_s10 }
  0x22   : > { %1109 = vrot.lane.b32.xlu1 %v2745_v7, %s3357_s11 }
  0x23   : > { %983 = vrot.lane.b32.xlu0 %v2714_v8, %s3356_s10 }
  0x26   : > { %729 = vrot.lane.b32.xlu1 %v2745_v7, %s3353_s30 }
  0x27   : > { %603 = vrot.lane.b32.xlu0 %v2714_v8, %s3354_s8 }
  0x2a   : > { %1237 = vrot.lane.b32.xlu1 %v3449_v9, %s3358_s12 }
  0x2b   : > { %1111 = vrot.lane.b32.xlu0 %v2746_v10, %s3357_s11 }
  0x2e   : > { %857 = vrot.lane.b32.xlu1 %v3449_v9, %s3355_s9 }
  0x2f   : > { %731 = vrot.lane.b32.xlu0 %v2746_v10, %s3353_s30 }
  0x32   : > { %1365 = vrot.lane.b32.xlu1 %v2809_v14, %s3359_s21 }
  0x33   : > { %1239 = vrot.lane.b32.xlu0 %v3466_v15, %s3358_s12 }
  0x36   : > { %985 = vrot.lane.b32.xlu1 %v2809_v14, %s3356_s10 }
  0x37   : > { %859 = vrot.lane.b32.xlu0 %v3466_v15, %s3355_s9 }
  0x3a   : > { %1493 = vrot.lane.b32.xlu1 %v2841_v19, %s3361_s22 }
  0x3b   : > { %1367 = vrot.lane.b32.xlu0 %v2810_v20, %s3359_s21 }
  0x3e   : > { %987 = vrot.lane.b32.xlu1 %v2810_v20, %s3356_s10 }
  0x3f   : > { %605 = vrot.lane.b32.xlu0 %v2809_v14, %s3354_s8  ;;  %v2817_v14 = vld [vmem:[%s3419_s29 + $0x91] sm:$0xff] }
  0x42   : > { %1495 = vrot.lane.b32.xlu1 %v2842_v21, %s3361_s22 }
  0x43   : > { %1113 = vrot.lane.b32.xlu0 %v2841_v19, %s3357_s11 }
  0x46   : > { %733 = vrot.lane.b32.xlu1 %v2841_v19, %s3353_s30 }
  0x47   : > { %607 = vrot.lane.b32.xlu0 %v2810_v20, %s3354_s8 }
  0x4a   : > { %1241 = vrot.lane.b32.xlu1 %v3492_v22, %s3358_s12 }
  0x4b   : > { %1115 = vrot.lane.b32.xlu0 %v2842_v21, %s3357_s11 }
  0x4e   : > { %861 = vrot.lane.b32.xlu1 %v3492_v22, %s3355_s9 }
  0x4f   : > { %735 = vrot.lane.b32.xlu0 %v2842_v21, %s3353_s30 }
  0x52   : > { %1369 = vrot.lane.b32.xlu1 %v2811_v23, %s3359_s21 }
  0x53   : > { %1243 = vrot.lane.b32.xlu0 %v3502_v24, %s3358_s12 }
  0x56   : > { %989 = vrot.lane.b32.xlu1 %v2811_v23, %s3356_s10 }
  0x57   : > { %863 = vrot.lane.b32.xlu0 %v3502_v24, %s3355_s9 }
  0x5a   : > { %1497 = vrot.lane.b32.xlu1 %v2843_v25, %s3361_s22 }
  0x5b   : > { %1371 = vrot.lane.b32.xlu0 %v2812_v26, %s3359_s21 }
  0x5e   : > { %991 = vrot.lane.b32.xlu1 %v2812_v26, %s3356_s10 }
  0x5f   : > { %609 = vrot.lane.b32.xlu0 %v2811_v23, %s3354_s8 }
  0x62   : > { %1499 = vrot.lane.b32.xlu1 %v2844_v27, %s3361_s22 }
  0x63   : > { %1117 = vrot.lane.b32.xlu0 %v2843_v25, %s3357_s11 }
  0x66   : > { %737 = vrot.lane.b32.xlu1 %v2843_v25, %s3353_s30 }
  0x67   : > { %611 = vrot.lane.b32.xlu0 %v2812_v26, %s3354_s8 }
  0x6a   : > { %1245 = vrot.lane.b32.xlu1 %v3522_v28, %s3358_s12 }
  0x6b   : > { %1119 = vrot.lane.b32.xlu0 %v2844_v27, %s3357_s11 }
  0x6e   : > { %865 = vrot.lane.b32.xlu1 %v3522_v28, %s3355_s9 }
  0x6f   : > { %739 = vrot.lane.b32.xlu0 %v2844_v27, %s3353_s30 }
  0x72   : > { %1373 = vrot.lane.b32.xlu1 %v2813_v29, %s3359_s21 }
  0x73   : > { %1247 = vrot.lane.b32.xlu0 %v3532_v30, %s3358_s12 }
  0x76   : > { %993 = vrot.lane.b32.xlu1 %v2813_v29, %s3356_s10 }
  0x77   : > { %867 = vrot.lane.b32.xlu0 %v3532_v30, %s3355_s9 }
  0x7a   : > { %1501 = vrot.lane.b32.xlu1 %v2845_v31, %s3361_s22 }
  0x7b   : > { %1375 = vrot.lane.b32.xlu0 %v2814_v32, %s3359_s21 }
  0x7e   : > { %995 = vrot.lane.b32.xlu1 %v2814_v32, %s3356_s10 }
  0x7f   : > { %613 = vrot.lane.b32.xlu0 %v2813_v29, %s3354_s8 }
  0x82   : > { %1503 = vrot.lane.b32.xlu1 %v2846_v33, %s3361_s22 }
  0x83   : > { %1121 = vrot.lane.b32.xlu0 %v2845_v31, %s3357_s11 }
  0x84   : > { %v726_v34 = vpop.permute.xlu1 %725 }
  0x85   : > { %v598_v35 = vpop.permute.xlu0 %597 }
  0x86   : > { %741 = vrot.lane.b32.xlu1 %v2845_v31, %s3353_s30  ;;  %v1590_v57 = vsel %vm1589_vm3, %v275_v56, %v598_v35  ;;  %v2849_v31 = vld [vmem:[%s3419_s29 + $0x92] sm:$0xff] }
  0x87   : > { %615 = vrot.lane.b32.xlu0 %v2814_v32, %s3354_s8  ;;  %v1623_v60 = vsel %vm1622_vm4, %v1590_v57, %v726_v34  ;;  %v2818_v32 = vld [vmem:[%s3419_s29 + $0x99] sm:$0xff] }
  0x88   : > { %v3554_v37 = vpop.permute.xlu1 %727 }
  0x89   : > { %v600_v38 = vpop.permute.xlu0 %599 }
  0x8a   : > { %1249 = vrot.lane.b32.xlu1 %v3552_v36, %s3358_s12  ;;  %v1591_v7 = vsel %vm1589_vm3, %v276_v1, %v600_v38  ;;  %v2850_v38 = vld [vmem:[%s3419_s29 + $0x9a] sm:$0xff] }
  0x8b   : > { %1123 = vrot.lane.b32.xlu0 %v2846_v33, %s3357_s11  ;;  %v1624_v13 = vsel %vm1622_vm4, %v1591_v7, %v3554_v37 }
  0x8c   : > { %v3559_v39 = vpop.permute.xlu1 %855 }
  0x8d   : > { %v854_v40 = vpop.permute.xlu0 %853  ;;  %v1657_v17 = vsel %vm1655_vm5, %v1624_v13, %v3559_v39 }
  0x8e   : > { %869 = vrot.lane.b32.xlu1 %v3552_v36, %s3355_s9  ;;  %v1656_v62 = vsel %vm1655_vm5, %v1623_v60, %v854_v40  ;;  %v2819_v60 = vld [vmem:[%s3419_s29 + $0xa9] sm:$0xff] }
  0x8f   : > { %743 = vrot.lane.b32.xlu0 %v2846_v33, %s3353_s30 }
  0x90   : > { %v3568_v43 = vpop.permute.xlu1 %601 }
  0x91   : > { %v982_v44 = vpop.permute.xlu0 %981 }
  0x92   : > { %1377 = vrot.lane.b32.xlu1 %v2815_v41, %s3359_s21  ;;  %v1689_v2 = vsel %vm1688_vm6, %v1656_v62, %v982_v44  ;;  %v3693_v62 = vld [vmem:[%s3419_s29 + $0xb0] sm:$0xff] }
  0x93   : > { %1251 = vrot.lane.b32.xlu0 %v3566_v42, %s3358_s12 }
  0x94   : > { %v1110_v45 = vpop.permute.xlu1 %1109 }
  0x95   : > { %v984_v46 = vpop.permute.xlu0 %983  ;;  %v1722_v3 = vsel %vm1721_vm7, %v1689_v2, %v1110_v45  ;;  %v1592_v45 = vsel %vm1589_vm3, %v3433_v5, %v3568_v43 }
  0x96   : > { %997 = vrot.lane.b32.xlu1 %v2815_v41, %s3356_s10  ;;  %v1690_v20 = vsel %vm1688_vm6, %v1657_v17, %v984_v46  ;;  %v2852_v17 = vld [vmem:[%s3419_s29 + $0xb2] sm:$0xff] }
  0x97   : > { %871 = vrot.lane.b32.xlu0 %v3566_v42, %s3355_s9 }
  0x98   : > { %v3578_v49 = vpop.permute.xlu1 %729 }
  0x99   : > { %v3580_v50 = vpop.permute.xlu0 %603  ;;  %v1625_v46 = vsel %vm1622_vm4, %v1592_v45, %v3578_v49  ;;  %v2821_v45 = vld [vmem:[%s3419_s29 + $0xc1] sm:$0xff] }
  0x9a   : > { %1505 = vrot.lane.b32.xlu1 %v2847_v47, %s3361_s22 }
  0x9b   : > { %1379 = vrot.lane.b32.xlu0 %v2816_v48, %s3359_s21 }
  0x9c   : > { %v1238_v51 = vpop.permute.xlu1 %1237 }
  0x9d   : > { %v1112_v52 = vpop.permute.xlu0 %1111  ;;  %v1755_v6 = vsel %vm1754_vm8, %v1722_v3, %v1238_v51 }
  0x9e   : > { %999 = vrot.lane.b32.xlu1 %v2816_v48, %s3356_s10  ;;  %v1723_v21 = vsel %vm1721_vm7, %v1690_v20, %v1112_v52 }
  0x9f   : > { %617 = vrot.lane.b32.xlu0 %v2815_v41, %s3354_s8 }
  0xa0   : > { %v3587_v54 = vpop.permute.xlu1 %857 }
  0xa1   : > { %v3589_v55 = vpop.permute.xlu0 %731 }
  0xa2   : > { %1507 = vrot.lane.b32.xlu1 %v2848_v53, %s3361_s22 }
  0xa3   : > { %1125 = vrot.lane.b32.xlu0 %v2847_v47, %s3357_s11 }
  0xa4   : > { %v1366_v58 = vpop.permute.xlu1 %1365 }
  0xa5   : > { %v1240_v59 = vpop.permute.xlu0 %1239  ;;  %v1788_v8 = vsel %vm1787_vm9, %v1755_v6, %v1366_v58  ;;  %v1593_v58 = vsel %vm1589_vm3, %v3430_v4, %v3580_v50 }
  0xa6   : > { %745 = vrot.lane.b32.xlu1 %v2847_v47, %s3353_s30  ;;  %v1756_v23 = vsel %vm1754_vm8, %v1723_v21, %v1240_v59  ;;  %v3667_v47 = vld [vmem:[%s3419_s29 + $0xa8] sm:$0xff]  ;;  %v1626_v59 = vsel %vm1622_vm4, %v1593_v58, %v3589_v55 }
  0xa7   : > { %619 = vrot.lane.b32.xlu0 %v2816_v48, %s3354_s8  ;;  %v1658_v48 = vsel %vm1655_vm5, %v1625_v46, %v3587_v54  ;;  %v3761_v46 = vld [vmem:[%s3419_s29 + $0xc8] sm:$0xff] }
  0xa8   : > { %v3602_v63 = vpop.permute.xlu1 %985 }
  0xa9   : > { %v3604_v0 = vpop.permute.xlu0 %859  ;;  %v1691_v5 = vsel %vm1688_vm6, %v1658_v48, %v3602_v63 }
  0xaa   : > { %1253 = vrot.lane.b32.xlu1 %v3599_v61, %s3358_s12  ;;  %v1659_v63 = vsel %vm1655_vm5, %v1626_v59, %v3604_v0 }
  0xab   : > { %1127 = vrot.lane.b32.xlu0 %v2848_v53, %s3357_s11 }
  0xac   : > { %v1494_v10 = vpop.permute.xlu1 %1493 }
  0xad   : > { %v1368_v11 = vpop.permute.xlu0 %1367  ;;  %v1821_v12 = vsel %vm1820_vm10, %v1788_v8, %v1494_v10  ;;  %v2851_v8 = vld [vmem:[%s3419_s29 + $0xaa] sm:$0xff] }
  0xae   : > { %873 = vrot.lane.b32.xlu1 %v3599_v61, %s3355_s9  ;;  %3019 = vmatprep.mubr.msk.f32.mxu0 %vm1864_vm11, %v1821_v12  ;;  %v1789_v25 = vsel %vm1787_vm9, %v1756_v23, %v1368_v11  ;;  %v2820_v10 = vld [vmem:[%s3419_s29 + $0xb1] sm:$0xff] }
  0xaf   : > { %747 = vrot.lane.b32.xlu0 %v2848_v53, %s3353_s30 }
  0xb0   : > { %v988_v18 = vpop.permute.xlu1 %987 }
  0xb1   : > { %v3628_v19 = vpop.permute.xlu0 %605  ;;  %v1692_v50 = vsel %vm1688_vm6, %v1659_v63, %v988_v18  ;;  %v2854_v63 = vld [vmem:[%s3419_s29 + $0xca] sm:$0xff] }
  0xb2   : > { %1381 = vrot.lane.b32.xlu1 %v2817_v14, %s3359_s21 }
  0xb3   : > { %1255 = vrot.lane.b32.xlu0 %v3624_v16, %s3358_s12 }
  0xb4   : > { %v1496_v26 = vpop.permute.xlu1 %1495 }
  0xb5   : > { %v1114_v27 = vpop.permute.xlu0 %1113  ;;  %v1822_v29 = vsel %vm1820_vm10, %v1789_v25, %v1496_v26  ;;  %v1594_v25 = vsel %vm1589_vm3, %v3449_v9, %v3628_v19 }
  0xb6   : > { %1001 = vrot.lane.b32.xlu1 %v2817_v14, %s3356_s10  ;;  %3020 = vmatmul.mubr.msk.f32.vlgmr.msra.gmra.mrb[0].mxu0 %vm1864_vm11, %v1822_v29  ;;  %v1724_v43 = vsel %vm1721_vm7, %v1691_v5, %v1114_v27  ;;  %v3736_v27 = vld [vmem:[%s3419_s29 + $0xc0] sm:$0xff] }
  0xb7   : > { %875 = vrot.lane.b32.xlu0 %v3624_v16, %s3355_s9 }
  0xb8   : > { %v3644_v33 = vpop.permute.xlu1 %733 }
  0xb9   : > { %v3646_v34 = vpop.permute.xlu0 %607  ;;  %v1627_v26 = vsel %vm1622_vm4, %v1594_v25, %v3644_v33  ;;  %v2823_v25 = vld [vmem:[%s3419_s29 + $0xd9] sm:$0xff] }
  0xba   : > { %1509 = vrot.lane.b32.xlu1 %v2849_v31, %s3361_s22 }
  0xbb   : > { %1383 = vrot.lane.b32.xlu0 %v2818_v32, %s3359_s21 }
  0xbc   : > { %v1242_v35 = vpop.permute.xlu1 %1241 }
  0xbd   : > { %v1116_v37 = vpop.permute.xlu0 %1115  ;;  %v1757_v49 = vsel %vm1754_vm8, %v1724_v43, %v1242_v35 }
  0xbe   : > { %1003 = vrot.lane.b32.xlu1 %v2818_v32, %s3356_s10  ;;  %v1725_v2 = vsel %vm1721_vm7, %v1692_v50, %v1116_v37 }
  0xbf   : > { %621 = vrot.lane.b32.xlu0 %v2817_v14, %s3354_s8 }
  0xc0   : > { %v3653_v39 = vpop.permute.xlu1 %861 }
  0xc1   : > { %v3655_v40 = vpop.permute.xlu0 %735  ;;  %v1660_v29 = vsel %vm1655_vm5, %v1627_v26, %v3653_v39  ;;  %v3829_v26 = vld [vmem:[%s3419_s29 + $0xe0] sm:$0xff] }
  0xc2   : > { %1511 = vrot.lane.b32.xlu1 %v2850_v38, %s3361_s22 }
  0xc3   : > { %1129 = vrot.lane.b32.xlu0 %v2849_v31, %s3357_s11 }
  0xc4   : > { %v1370_v41 = vpop.permute.xlu1 %1369 }
  0xc5   : > { %v1244_v44 = vpop.permute.xlu0 %1243  ;;  %v1790_v53 = vsel %vm1787_vm9, %v1757_v49, %v1370_v41  ;;  %v1595_v41 = vsel %vm1589_vm3, %v3466_v15, %v3646_v34 }
  0xc6   : > { %749 = vrot.lane.b32.xlu1 %v2849_v31, %s3353_s30  ;;  %v1758_v55 = vsel %vm1754_vm8, %v1725_v2, %v1244_v44  ;;  %v1628_v44 = vsel %vm1622_vm4, %v1595_v41, %v3655_v40 }
  0xc7   : > { %623 = vrot.lane.b32.xlu0 %v2818_v32, %s3354_s8 }
  0xc8   : > { %v990_v51 = vpop.permute.xlu1 %989 }
  0xc9   : > { %v3671_v52 = vpop.permute.xlu0 %863  ;;  %v1693_v35 = vsel %vm1688_vm6, %v1660_v29, %v990_v51 }
  0xca   : > { %1257 = vrot.lane.b32.xlu1 %v3667_v47, %s3358_s12  ;;  %v1661_v48 = vsel %vm1655_vm5, %v1628_v44, %v3671_v52 }
  0xcb   : > { %1131 = vrot.lane.b32.xlu0 %v2850_v38, %s3357_s11 }
  0xcc   : > { %v1498_v54 = vpop.permute.xlu1 %1497 }
  0xcd   : > { %v1372_v56 = vpop.permute.xlu0 %1371  ;;  %v1823_v57 = vsel %vm1820_vm10, %v1790_v53, %v1498_v54  ;;  %v2853_v54 = vld [vmem:[%s3419_s29 + $0xc2] sm:$0xff] }
  0xce   : > { %877 = vrot.lane.b32.xlu1 %v3667_v47, %s3355_s9  ;;  %3022 = vmatprep.mubr.msk.f32.mxu0 %vm1864_vm11, %v1823_v57  ;;  %v1791_v3 = vsel %vm1787_vm9, %v1758_v55, %v1372_v56  ;;  %v2822_v56 = vld [vmem:[%s3419_s29 + $0xc9] sm:$0xff] }
  0xcf   : > { %751 = vrot.lane.b32.xlu0 %v2850_v38, %s3353_s30 }
  0xd0   : > { %v992_v1 = vpop.permute.xlu1 %991 }
  0xd1   : > { %v3697_v4 = vpop.permute.xlu0 %609  ;;  %v1694_v34 = vsel %vm1688_vm6, %v1661_v48, %v992_v1  ;;  %v2856_v48 = vld [vmem:[%s3419_s29 + $0xe2] sm:$0xff] }
  0xd2   : > { %1385 = vrot.lane.b32.xlu1 %v2819_v60, %s3359_s21 }
  0xd3   : > { %1259 = vrot.lane.b32.xlu0 %v3693_v62, %s3358_s12 }
  0xd4   : > { %v1500_v6 = vpop.permute.xlu1 %1499 }
  0xd5   : > { %v1118_v0 = vpop.permute.xlu0 %1117  ;;  %v1824_v7 = vsel %vm1820_vm10, %v1791_v3, %v1500_v6  ;;  %v1596_v3 = vsel %vm1589_vm3, %v3492_v22, %v3697_v4 }
  0xd6   : > { %1005 = vrot.lane.b32.xlu1 %v2819_v60, %s3356_s10  ;;  %3023 = vmatmul.mubr.msk.f32.gmra.mrb[2].mxu0 %vm1864_vm11, %v1824_v7  ;;  %v1726_v9 = vsel %vm1721_vm7, %v1693_v35, %v1118_v0  ;;  %v3804_v0 = vld [vmem:[%s3419_s29 + $0xd8] sm:$0xff] }
  0xd7   : > { %879 = vrot.lane.b32.xlu0 %v3693_v62, %s3355_s9 }
  0xd8   : > { %v3713_v11 = vpop.permute.xlu1 %737 }
  0xd9   : > { %v3715_v12 = vpop.permute.xlu0 %611  ;;  %v1629_v6 = vsel %vm1622_vm4, %v1596_v3, %v3713_v11  ;;  %v2825_v3 = vld [vmem:[%s3419_s29 + $0xf1] sm:$0xff] }
  0xda   : > { %1513 = vrot.lane.b32.xlu1 %v2851_v8, %s3361_s22 }
  0xdb   : > { %1387 = vrot.lane.b32.xlu0 %v2820_v10, %s3359_s21 }
  0xdc   : > { %v1246_v13 = vpop.permute.xlu1 %1245 }
  0xdd   : > { %v1120_v14 = vpop.permute.xlu0 %1119  ;;  %v1759_v19 = vsel %vm1754_vm8, %v1726_v9, %v1246_v13 }
  0xde   : > { %1007 = vrot.lane.b32.xlu1 %v2820_v10, %s3356_s10  ;;  %v1727_v5 = vsel %vm1721_vm7, %v1694_v34, %v1120_v14 }
  0xdf   : > { %625 = vrot.lane.b32.xlu0 %v2819_v60, %s3354_s8 }
  0xe0   : > { %v3722_v18 = vpop.permute.xlu1 %865 }
  0xe1   : > { %v3724_v20 = vpop.permute.xlu0 %739  ;;  %v1662_v7 = vsel %vm1655_vm5, %v1629_v6, %v3722_v18  ;;  %v3897_v6 = vld [vmem:[%s3419_s29 + $0xf8] sm:$0xff] }
  0xe2   : > { %1515 = vrot.lane.b32.xlu1 %v2852_v17, %s3361_s22 }
  0xe3   : > { %1133 = vrot.lane.b32.xlu0 %v2851_v8, %s3357_s11 }
  0xe4   : > { %v1374_v21 = vpop.permute.xlu1 %1373 }
  0xe5   : > { %v1248_v23 = vpop.permute.xlu0 %1247  ;;  %v1792_v33 = vsel %vm1787_vm9, %v1759_v19, %v1374_v21  ;;  %v1597_v21 = vsel %vm1589_vm3, %v3502_v24, %v3715_v12 }
  0xe6   : > { %753 = vrot.lane.b32.xlu1 %v2851_v8, %s3353_s30  ;;  %v1760_v40 = vsel %vm1754_vm8, %v1727_v5, %v1248_v23  ;;  %v1630_v23 = vsel %vm1622_vm4, %v1597_v21, %v3724_v20 }
  0xe7   : > { %627 = vrot.lane.b32.xlu0 %v2820_v10, %s3354_s8 }
  0xe8   : > { %v994_v31 = vpop.permute.xlu1 %993 }
  0xe9   : > { %v3740_v32 = vpop.permute.xlu0 %867  ;;  %v1695_v13 = vsel %vm1688_vm6, %v1662_v7, %v994_v31 }
  0xea   : > { %1261 = vrot.lane.b32.xlu1 %v3736_v27, %s3358_s12  ;;  %v1663_v29 = vsel %vm1655_vm5, %v1630_v23, %v3740_v32 }
  0xeb   : > { %1135 = vrot.lane.b32.xlu0 %v2852_v17, %s3357_s11 }
  0xec   : > { %v1502_v37 = vpop.permute.xlu1 %1501 }
  0xed   : > { %v1376_v38 = vpop.permute.xlu0 %1375  ;;  %v1825_v39 = vsel %vm1820_vm10, %v1792_v33, %v1502_v37  ;;  %v2855_v37 = vld [vmem:[%s3419_s29 + $0xda] sm:$0xff] }
  0xee   : > { %881 = vrot.lane.b32.xlu1 %v3736_v27, %s3355_s9  ;;  %3025 = vmatprep.mubr.msk.f32.mxu0 %vm1864_vm11, %v1825_v39  ;;  %v1793_v43 = vsel %vm1787_vm9, %v1760_v40, %v1376_v38  ;;  %v2824_v38 = vld [vmem:[%s3419_s29 + $0xe1] sm:$0xff] }
  0xef   : > { %755 = vrot.lane.b32.xlu0 %v2852_v17, %s3353_s30 }
  0xf0   : > { %v996_v51 = vpop.permute.xlu1 %995 }
  0xf1   : > { %v3765_v15 = vpop.permute.xlu0 %613  ;;  %v1696_v12 = vsel %vm1688_vm6, %v1663_v29, %v996_v51  ;;  %v2858_v29 = vld [vmem:[%s3419_s29 + $0xfa] sm:$0xff] }
  0xf2   : > { %1389 = vrot.lane.b32.xlu1 %v2821_v45, %s3359_s21 }
  0xf3   : > { %1263 = vrot.lane.b32.xlu0 %v3761_v46, %s3358_s12 }
  0xf4   : > { %v1504_v49 = vpop.permute.xlu1 %1503 }
  0xf5   : > { %v1122_v52 = vpop.permute.xlu0 %1121  ;;  %v1826_v53 = vsel %vm1820_vm10, %v1793_v43, %v1504_v49  ;;  %v1598_v43 = vsel %vm1589_vm3, %v3522_v28, %v3765_v15 }
  0xf6   : > { %1009 = vrot.lane.b32.xlu1 %v2821_v45, %s3356_s10  ;;  %3026 = vmatmul.mubr.msk.f32.gmra.mrb[4].mxu0 %vm1864_vm11, %v1826_v53  ;;  %v1728_v22 = vsel %vm1721_vm7, %v1695_v13, %v1122_v52  ;;  %v3872_v52 = vld [vmem:[%s3419_s29 + $0xf0] sm:$0xff] }
  0xf7   : > { %883 = vrot.lane.b32.xlu0 %v3761_v46, %s3355_s9 }
  0xf8   : > { %v3781_v57 = vpop.permute.xlu1 %741 }
  0xf9   : > { %v3783_v58 = vpop.permute.xlu0 %615  ;;  %v1631_v49 = vsel %vm1622_vm4, %v1598_v43, %v3781_v57  ;;  %v2827_v43 = vld [vmem:[%s3419_s29 + $0x109] sm:$0xff] }
  0xfa   : > { %1517 = vrot.lane.b32.xlu1 %v2853_v54, %s3361_s22 }
  0xfb   : > { %1391 = vrot.lane.b32.xlu0 %v2822_v56, %s3359_s21 }
  0xfc   : > { %v1250_v59 = vpop.permute.xlu1 %1249 }
  0xfd   : > { %v1124_v60 = vpop.permute.xlu0 %1123  ;;  %v1761_v4 = vsel %vm1754_vm8, %v1728_v22, %v1250_v59 }
  0xfe   : > { %1011 = vrot.lane.b32.xlu1 %v2822_v56, %s3356_s10  ;;  %v1729_v35 = vsel %vm1721_vm7, %v1696_v12, %v1124_v60 }
  0xff   : > { %629 = vrot.lane.b32.xlu0 %v2821_v45, %s3354_s8 }
 0x100   : > { %v3790_v1 = vpop.permute.xlu1 %869 }
 0x101   : > { %v3792_v50 = vpop.permute.xlu0 %743  ;;  %v1664_v53 = vsel %vm1655_vm5, %v1631_v49, %v3790_v1  ;;  %v3965_v49 = vld [vmem:[%s3419_s29 + $0x110] sm:$0xff] }
 0x102   : > { %1519 = vrot.lane.b32.xlu1 %v2854_v63, %s3361_s22 }
 0x103   : > { %1137 = vrot.lane.b32.xlu0 %v2853_v54, %s3357_s11 }
 0x104   : > { %v1378_v2 = vpop.permute.xlu1 %1377 }
 0x105   : > { %v1252_v55 = vpop.permute.xlu0 %1251  ;;  %v1794_v11 = vsel %vm1787_vm9, %v1761_v4, %v1378_v2  ;;  %v1599_v2 = vsel %vm1589_vm3, %v3532_v30, %v3783_v58 }
 0x106   : > { %757 = vrot.lane.b32.xlu1 %v2853_v54, %s3353_s30  ;;  %v1762_v20 = vsel %vm1754_vm8, %v1729_v35, %v1252_v55  ;;  %v1632_v55 = vsel %vm1622_vm4, %v1599_v2, %v3792_v50 }
 0x107   : > { %631 = vrot.lane.b32.xlu0 %v2822_v56, %s3354_s8 }
 0x108   : > { %v998_v8 = vpop.permute.xlu1 %997 }
 0x109   : > { %v3808_v10 = vpop.permute.xlu0 %871  ;;  %v1697_v59 = vsel %vm1688_vm6, %v1664_v53, %v998_v8 }
 0x10a   : > { %1265 = vrot.lane.b32.xlu1 %v3804_v0, %s3358_s12  ;;  %v1665_v7 = vsel %vm1655_vm5, %v1632_v55, %v3808_v10 }
 0x10b   : > { %1139 = vrot.lane.b32.xlu0 %v2854_v63, %s3357_s11 }
 0x10c   : > { %v1506_v14 = vpop.permute.xlu1 %1505 }
 0x10d   : > { %v1380_v17 = vpop.permute.xlu0 %1379  ;;  %v1827_v18 = vsel %vm1820_vm10, %v1794_v11, %v1506_v14  ;;  %v2857_v14 = vld [vmem:[%s3419_s29 + $0xf2] sm:$0xff] }
 0x10e   : > { %885 = vrot.lane.b32.xlu1 %v3804_v0, %s3355_s9  ;;  %3028 = vmatprep.mubr.msk.f32.mxu0 %vm1864_vm11, %v1827_v18  ;;  %v1795_v9 = vsel %vm1787_vm9, %v1762_v20, %v1380_v17  ;;  %v2826_v17 = vld [vmem:[%s3419_s29 + $0xf9] sm:$0xff] }
 0x10f   : > { %759 = vrot.lane.b32.xlu0 %v2854_v63, %s3353_s30 }
 0x110   : > { %v1000_v31 = vpop.permute.xlu1 %999 }
 0x111   : > { %v3833_v24 = vpop.permute.xlu0 %617  ;;  %v1698_v58 = vsel %vm1688_vm6, %v1665_v7, %v1000_v31  ;;  %v2860_v7 = vld [vmem:[%s3419_s29 + $0x112] sm:$0xff] }
 0x112   : > { %1393 = vrot.lane.b32.xlu1 %v2823_v25, %s3359_s21 }
 0x113   : > { %1267 = vrot.lane.b32.xlu0 %v3829_v26, %s3358_s12 }
 0x114   : > { %v1508_v19 = vpop.permute.xlu1 %1507 }
 0x115   : > { %v1126_v32 = vpop.permute.xlu0 %1125  ;;  %v1828_v33 = vsel %vm1820_vm10, %v1795_v9, %v1508_v19  ;;  %v1600_v9 = vsel %vm1589_vm3, %v3552_v36, %v3833_v24 }
 0x116   : > { %1013 = vrot.lane.b32.xlu1 %v2823_v25, %s3356_s10  ;;  %3029 = vmatmul.mubr.msk.f32.gmra.mrb[6].mxu0 %vm1864_vm11, %v1828_v33  ;;  %v1730_v28 = vsel %vm1721_vm7, %v1697_v59, %v1126_v32  ;;  %v3940_v32 = vld [vmem:[%s3419_s29 + $0x108] sm:$0xff] }
 0x117   : > { %887 = vrot.lane.b32.xlu0 %v3829_v26, %s3355_s9 }
 0x118   : > { %v3849_v39 = vpop.permute.xlu1 %745 }
 0x119   : > { %v3851_v41 = vpop.permute.xlu0 %619  ;;  %v1633_v19 = vsel %vm1622_vm4, %v1600_v9, %v3849_v39  ;;  %v2829_v9 = vld [vmem:[%s3419_s29 + $0x121] sm:$0xff] }
 0x11a   : > { %1521 = vrot.lane.b32.xlu1 %v2855_v37, %s3361_s22 }
 0x11b   : > { %1395 = vrot.lane.b32.xlu0 %v2824_v38, %s3359_s21 }
 0x11c   : > { %v1254_v44 = vpop.permute.xlu1 %1253 }
 0x11d   : > { %v1128_v45 = vpop.permute.xlu0 %1127  ;;  %v1763_v15 = vsel %vm1754_vm8, %v1730_v28, %v1254_v44 }
 0x11e   : > { %1015 = vrot.lane.b32.xlu1 %v2824_v38, %s3356_s10  ;;  %v1731_v13 = vsel %vm1721_vm7, %v1698_v58, %v1128_v45 }
 0x11f   : > { %633 = vrot.lane.b32.xlu0 %v2823_v25, %s3354_s8 }
 0x120   : > { %v3858_v51 = vpop.permute.xlu1 %873 }
 0x121   : > { %v3860_v34 = vpop.permute.xlu0 %747  ;;  %v1666_v33 = vsel %vm1655_vm5, %v1633_v19, %v3858_v51  ;;  %v4033_v19 = vld [vmem:[%s3419_s29 + $0x128] sm:$0xff] }
 0x122   : > { %1523 = vrot.lane.b32.xlu1 %v2856_v48, %s3361_s22 }
 0x123   : > { %1141 = vrot.lane.b32.xlu0 %v2855_v37, %s3357_s11 }
 0x124   : > { %v1382_v5 = vpop.permute.xlu1 %1381 }
 0x125   : > { %v1256_v40 = vpop.permute.xlu0 %1255  ;;  %v1796_v57 = vsel %vm1787_vm9, %v1763_v15, %v1382_v5  ;;  %v1601_v5 = vsel %vm1589_vm3, %v3566_v42, %v3851_v41 }
 0x126   : > { %761 = vrot.lane.b32.xlu1 %v2855_v37, %s3353_s30  ;;  %v1764_v50 = vsel %vm1754_vm8, %v1731_v13, %v1256_v40  ;;  %v1634_v40 = vsel %vm1622_vm4, %v1601_v5, %v3860_v34 }
 0x127   : > { %635 = vrot.lane.b32.xlu0 %v2824_v38, %s3354_s8 }
 0x128   : > { %v1002_v54 = vpop.permute.xlu1 %1001 }
 0x129   : > { %v3876_v56 = vpop.permute.xlu0 %875  ;;  %v1699_v44 = vsel %vm1688_vm6, %v1666_v33, %v1002_v54 }
 0x12a   : > { %1269 = vrot.lane.b32.xlu1 %v3872_v52, %s3358_s12  ;;  %v1667_v53 = vsel %vm1655_vm5, %v1634_v40, %v3876_v56 }
 0x12b   : > { %1143 = vrot.lane.b32.xlu0 %v2856_v48, %s3357_s11 }
 0x12c   : > { %v1510_v60 = vpop.permute.xlu1 %1509 }
 0x12d   : > { %v1384_v63 = vpop.permute.xlu0 %1383  ;;  %v1829_v1 = vsel %vm1820_vm10, %v1796_v57, %v1510_v60  ;;  %v2859_v60 = vld [vmem:[%s3419_s29 + $0x10a] sm:$0xff] }
 0x12e   : > { %889 = vrot.lane.b32.xlu1 %v3872_v52, %s3355_s9  ;;  %3031 = vmatprep.mubr.msk.f32.mxu0 %vm1864_vm11, %v1829_v1  ;;  %v1797_v22 = vsel %vm1787_vm9, %v1764_v50, %v1384_v63  ;;  %v2828_v63 = vld [vmem:[%s3419_s29 + $0x111] sm:$0xff] }
 0x12f   : > { %763 = vrot.lane.b32.xlu0 %v2856_v48, %s3353_s30 }
 0x130   : > { %v1004_v8 = vpop.permute.xlu1 %1003 }
 0x131   : > { %v3901_v30 = vpop.permute.xlu0 %621  ;;  %v1700_v41 = vsel %vm1688_vm6, %v1667_v53, %v1004_v8  ;;  %v2862_v53 = vld [vmem:[%s3419_s29 + $0x12a] sm:$0xff] }
 0x132   : > { %1397 = vrot.lane.b32.xlu1 %v2825_v3, %s3359_s21 }
 0x133   : > { %1271 = vrot.lane.b32.xlu0 %v3897_v6, %s3358_s12 }
 0x134   : > { %v1512_v4 = vpop.permute.xlu1 %1511 }
 0x135   : > { %v1130_v10 = vpop.permute.xlu0 %1129  ;;  %v1830_v11 = vsel %vm1820_vm10, %v1797_v22, %v1512_v4  ;;  %v1602_v22 = vsel %vm1589_vm3, %v3599_v61, %v3901_v30 }
 0x136   : > { %1017 = vrot.lane.b32.xlu1 %v2825_v3, %s3356_s10  ;;  %3032 = vmatmul.mubr.msk.f32.gmra.mrb[8].mxu0 %vm1864_vm11, %v1830_v11  ;;  %v1732_v36 = vsel %vm1721_vm7, %v1699_v44, %v1130_v10  ;;  %v4008_v10 = vld [vmem:[%s3419_s29 + $0x120] sm:$0xff] }
 0x137   : > { %891 = vrot.lane.b32.xlu0 %v3897_v6, %s3355_s9 }
 0x138   : > { %v3917_v18 = vpop.permute.xlu1 %749 }
 0x139   : > { %v3919_v21 = vpop.permute.xlu0 %623  ;;  %v1635_v4 = vsel %vm1622_vm4, %v1602_v22, %v3917_v18 }
 0x13a   : > { %1525 = vrot.lane.b32.xlu1 %v2857_v14, %s3361_s22 }
 0x13b   : > { %1399 = vrot.lane.b32.xlu0 %v2826_v17, %s3359_s21 }
 0x13c   : > { %v1258_v23 = vpop.permute.xlu1 %1257 }
 0x13d   : > { %v1132_v25 = vpop.permute.xlu0 %1131  ;;  %v1765_v24 = vsel %vm1754_vm8, %v1732_v36, %v1258_v23 }
 0x13e   : > { %1019 = vrot.lane.b32.xlu1 %v2826_v17, %s3356_s10  ;;  %v1733_v59 = vsel %vm1721_vm7, %v1700_v41, %v1132_v25 }
 0x13f   : > { %637 = vrot.lane.b32.xlu0 %v2825_v3, %s3354_s8 }
 0x140   : > { %v3926_v31 = vpop.permute.xlu1 %877 }
 0x141   : > { %v3928_v12 = vpop.permute.xlu0 %751  ;;  %v1668_v11 = vsel %vm1655_vm5, %v1635_v4, %v3926_v31 }
 0x142   : > { %1527 = vrot.lane.b32.xlu1 %v2858_v29, %s3361_s22 }
 0x143   : > { %1145 = vrot.lane.b32.xlu0 %v2857_v14, %s3357_s11 }
 0x144   : > { %v1386_v35 = vpop.permute.xlu1 %1385 }
 0x145   : > { %v1260_v20 = vpop.permute.xlu0 %1259  ;;  %v1798_v39 = vsel %vm1787_vm9, %v1765_v24, %v1386_v35  ;;  %v1603_v35 = vsel %vm1589_vm3, %v3624_v16, %v3919_v21 }
 0x146   : > { %765 = vrot.lane.b32.xlu1 %v2857_v14, %s3353_s30  ;;  %v1766_v34 = vsel %vm1754_vm8, %v1733_v59, %v1260_v20  ;;  %v1636_v20 = vsel %vm1622_vm4, %v1603_v35, %v3928_v12 }
 0x147   : > { %639 = vrot.lane.b32.xlu0 %v2826_v17, %s3354_s8 }
 0x148   : > { %v1006_v37 = vpop.permute.xlu1 %1005 }
 0x149   : > { %v3944_v38 = vpop.permute.xlu0 %879  ;;  %v1701_v23 = vsel %vm1688_vm6, %v1668_v11, %v1006_v37 }
 0x14a   : > { %1273 = vrot.lane.b32.xlu1 %v3940_v32, %s3358_s12  ;;  %v1669_v33 = vsel %vm1655_vm5, %v1636_v20, %v3944_v38 }
 0x14b   : > { %1147 = vrot.lane.b32.xlu0 %v2858_v29, %s3357_s11 }
 0x14c   : > { %v1514_v45 = vpop.permute.xlu1 %1513 }
 0x14d   : > { %v1388_v48 = vpop.permute.xlu0 %1387  ;;  %v1831_v51 = vsel %vm1820_vm10, %v1798_v39, %v1514_v45  ;;  %v2861_v45 = vld [vmem:[%s3419_s29 + $0x122] sm:$0xff] }
 0x14e   : > { %893 = vrot.lane.b32.xlu1 %v3940_v32, %s3355_s9  ;;  %3034 = vmatprep.mubr.msk.f32.mxu0 %vm1864_vm11, %v1831_v51  ;;  %v1799_v28 = vsel %vm1787_vm9, %v1766_v34, %v1388_v48  ;;  %v2830_v48 = vld [vmem:[%s3419_s29 + $0x129] sm:$0xff] }
 0x14f   : > { %767 = vrot.lane.b32.xlu0 %v2858_v29, %s3353_s30 }
 0x150   : > { %v1008_v54 = vpop.permute.xlu1 %1007 }
 0x151   : > { %v3969_v42 = vpop.permute.xlu0 %625  ;;  %v1702_v21 = vsel %vm1688_vm6, %v1669_v33, %v1008_v54 }
 0x152   : > { %1401 = vrot.lane.b32.xlu1 %v2827_v43, %s3359_s21 }
 0x153   : > { %1275 = vrot.lane.b32.xlu0 %v3965_v49, %s3358_s12 }
 0x154   : > { %v1516_v15 = vpop.permute.xlu1 %1515 }
 0x155   : > { %v1134_v56 = vpop.permute.xlu0 %1133  ;;  %v1832_v57 = vsel %vm1820_vm10, %v1799_v28, %v1516_v15  ;;  %v1604_v28 = vsel %vm1589_vm3, %v3667_v47, %v3969_v42  ;;  %v4089_v47 = vld [vmem:[%s4737_s2] ss:$0 sm:$0xff] }
 0x156   : > { %1021 = vrot.lane.b32.xlu1 %v2827_v43, %s3356_s10  ;;  %3035 = vmatmul.mubr.msk.f32.gmra.mrb[10].mxu0 %vm1864_vm11, %v1832_v57  ;;  %v1734_v61 = vsel %vm1721_vm7, %v1701_v23, %v1134_v56  ;;  %v4078_v56 = vld [vmem:[%s3419_s29 + $0x138] sm:$0xff] }
 0x157   : > { %895 = vrot.lane.b32.xlu0 %v3965_v49, %s3355_s9 }
 0x158   : > { %v3985_v1 = vpop.permute.xlu1 %753 }
 0x159   : > { %v3987_v2 = vpop.permute.xlu0 %627  ;;  %v1637_v15 = vsel %vm1622_vm4, %v1604_v28, %v3985_v1 }
 0x15a   : > { %1529 = vrot.lane.b32.xlu1 %v2859_v60, %s3361_s22  ;;  %v1605_v23 = vsel %vm1589_vm3, %v3693_v62, %v3987_v2 }
 0x15b   : > { %1403 = vrot.lane.b32.xlu0 %v2828_v63, %s3359_s21 }
 0x15c   : > { %v1262_v55 = vpop.permute.xlu1 %1261 }
 0x15d   : > { %v1136_v3 = vpop.permute.xlu0 %1135  ;;  %v1767_v30 = vsel %vm1754_vm8, %v1734_v61, %v1262_v55 }
 0x15e   : > { %1023 = vrot.lane.b32.xlu1 %v2828_v63, %s3356_s10  ;;  %v1735_v44 = vsel %vm1721_vm7, %v1702_v21, %v1136_v3  ;;  %v2832_v21 = vld [vmem:[%s3419_s29 + $0x141] sm:$0xff] }
 0x15f   : > { %641 = vrot.lane.b32.xlu0 %v2827_v43, %s3354_s8 }
 0x160   : > { %v3994_v8 = vpop.permute.xlu1 %881 }
 0x161   : > { %v3996_v58 = vpop.permute.xlu0 %755  ;;  %v1670_v57 = vsel %vm1655_vm5, %v1637_v15, %v3994_v8 }
 0x162   : > { %1531 = vrot.lane.b32.xlu1 %v2860_v7, %s3361_s22 }
 0x163   : > { %1149 = vrot.lane.b32.xlu0 %v2859_v60, %s3357_s11 }
 0x164   : > { %v1390_v13 = vpop.permute.xlu1 %1389 }
 0x165   : > { %v1264_v50 = vpop.permute.xlu0 %1263  ;;  %v1800_v18 = vsel %vm1787_vm9, %v1767_v30, %v1390_v13  ;;  %v1638_v30 = vsel %vm1622_vm4, %v1605_v23, %v3996_v58 }
 0x166   : > { %769 = vrot.lane.b32.xlu1 %v2859_v60, %s3353_s30  ;;  %v1768_v12 = vsel %vm1754_vm8, %v1735_v44, %v1264_v50 }
 0x167   : > { %643 = vrot.lane.b32.xlu0 %v2828_v63, %s3354_s8 }
 0x168   : > { %v1010_v14 = vpop.permute.xlu1 %1009 }
 0x169   : > { %v4012_v17 = vpop.permute.xlu0 %883  ;;  %v1703_v42 = vsel %vm1688_vm6, %v1670_v57, %v1010_v14 }
 0x16a   : > { %1277 = vrot.lane.b32.xlu1 %v4008_v10, %s3358_s12 }
 0x16b   : > { %1151 = vrot.lane.b32.xlu0 %v2860_v7, %s3357_s11 }
 0x16c   : > { %v1518_v25 = vpop.permute.xlu1 %1517 }
 0x16d   : > { %v1392_v29 = vpop.permute.xlu0 %1391  ;;  %v1833_v31 = vsel %vm1820_vm10, %v1800_v18, %v1518_v25  ;;  %v2831_v18 = vld [vmem:[%s3419_s29 + $0x139] sm:$0xff] }
 0x16e   : > { %897 = vrot.lane.b32.xlu1 %v4008_v10, %s3355_s9  ;;  %3037 = vmatprep.mubr.msk.f32.mxu0 %vm1864_vm11, %v1833_v31  ;;  %v1801_v36 = vsel %vm1787_vm9, %v1768_v12, %v1392_v29  ;;  %v4118_v25 = vld [vmem:[%s3419_s29 + $0x140] sm:$0xff]  ;;  %v1671_v29 = vsel %vm1655_vm5, %v1638_v30, %v4012_v17 }
 0x16f   : > { %771 = vrot.lane.b32.xlu0 %v2860_v7, %s3353_s30 }
 0x170   : > { %v4037_v37 = vpop.permute.xlu1 %1011 }
 0x171   : > { %v4039_v16 = vpop.permute.xlu0 %629  ;;  %v1704_v31 = vsel %vm1688_vm6, %v1671_v29, %v4037_v37  ;;  %v2863_v37 = vld [vmem:[%s3419_s29 + $0x13a] sm:$0xff] }
 0x172   : > { %1405 = vrot.lane.b32.xlu1 %v2829_v9, %s3359_s21  ;;  %v1606_v15 = vsel %vm1589_vm3, %v3736_v27, %v4039_v16 }
 0x173   : > { %1279 = vrot.lane.b32.xlu0 %v4033_v19, %s3358_s12 }
 0x174   : > { %v1520_v24 = vpop.permute.xlu1 %1519 }
 0x175   : > { %v1138_v38 = vpop.permute.xlu0 %1137  ;;  %v1834_v39 = vsel %vm1820_vm10, %v1801_v36, %v1520_v24 }
 0x176   : > { %1025 = vrot.lane.b32.xlu1 %v2829_v9, %s3356_s10  ;;  %3038 = vmatmul.mubr.msk.f32.gmra.mrb[12].mxu0 %vm1864_vm11, %v1834_v39  ;;  %v1736_v55 = vsel %vm1721_vm7, %v1703_v42, %v1138_v38 }
 0x177   : > { %899 = vrot.lane.b32.xlu0 %v4033_v19, %s3355_s9 }
 0x178   : > { %v4055_v51 = vpop.permute.xlu1 %757 }
 0x179   : > { %v4057_v5 = vpop.permute.xlu0 %631  ;;  %v1639_v42 = vsel %vm1622_vm4, %v1606_v15, %v4055_v51 }
 0x17a   : > { %1533 = vrot.lane.b32.xlu1 %v2861_v45, %s3361_s22 }
 0x17b   : > { %1407 = vrot.lane.b32.xlu0 %v2830_v48, %s3359_s21 }
 0x17c   : > { %v1266_v40 = vpop.permute.xlu1 %1265 }
 0x17d   : > { %v1140_v43 = vpop.permute.xlu0 %1139  ;;  %v1769_v1 = vsel %vm1754_vm8, %v1736_v55, %v1266_v40  ;;  %v2864_v40 = vld [vmem:[%s3419_s29 + $0x142] sm:$0xff] }
 0x17e   : > { %1027 = vrot.lane.b32.xlu1 %v2830_v48, %s3356_s10  ;;  %v1737_v58 = vsel %vm1721_vm7, %v1704_v31, %v1140_v43 }
 0x17f   : > { %645 = vrot.lane.b32.xlu0 %v2829_v9, %s3354_s8 }
 0x180   : > { %v4064_v54 = vpop.permute.xlu1 %885 }
 0x181   : > { %v4066_v41 = vpop.permute.xlu0 %759 }
 0x182   : > { %1535 = vrot.lane.b32.xlu1 %v2862_v53, %s3361_s22 }
 0x183   : > { %1153 = vrot.lane.b32.xlu0 %v2861_v45, %s3357_s11 }
 0x184   : > { %v1394_v59 = vpop.permute.xlu1 %1393 }
 0x185   : > { %v1268_v34 = vpop.permute.xlu0 %1267  ;;  %v1802_v13 = vsel %vm1787_vm9, %v1769_v1, %v1394_v59  ;;  %v1672_v1 = vsel %vm1655_vm5, %v1639_v42, %v4064_v54 }
 0x186   : > { %773 = vrot.lane.b32.xlu1 %v2861_v45, %s3353_s30  ;;  %v1770_v35 = vsel %vm1754_vm8, %v1737_v58, %v1268_v34  ;;  %v2833_v58 = vld [vmem:[%s3419_s29 + $0x151] sm:$0xff] }
 0x187   : > { %647 = vrot.lane.b32.xlu0 %v2830_v48, %s3354_s8 }
 0x188   : > { %v4082_v60 = vpop.permute.xlu1 %1013 }
 0x189   : > { %v4084_v63 = vpop.permute.xlu0 %887  ;;  %v3021_v3 = vpop.f32.mrb[0].mxu0  ;;  %v1705_v16 = vsel %vm1688_vm6, %v1672_v1, %v4082_v60 }
 0x18a   : > { %1281 = vrot.lane.b32.xlu1 %v4078_v56, %s3358_s12  ;;  %v4098_v7 = vadd.f32 %v3021_v3, %v4089_v47  ;;  %v2031_v8 = vpop.f32.mrb[1].mxu0  ;;  %v4165_v3 = vld [vmem:[%s3419_s29 + $0x150] sm:$0xff] }
 0x18b   : > { %1155 = vrot.lane.b32.xlu0 %v2862_v53, %s3357_s11  ;;  %v4102_v50 = vadd.f32 %v4089_v47, %v2031_v8 }
 0x18c   : > { %v1522_v22 = vpop.permute.xlu1 %1521  ;;  %v2908_v11 = vmul.f32 -1.442695, %v4098_v7 }
 0x18d   : > { %v1396_v4 = vpop.permute.xlu0 %1395  ;;  %v1835_v14 = vsel %vm1820_vm10, %v1802_v13, %v1522_v22  ;;  %v2907_v61 = vmul.f32 -1.442695, %v4102_v50 }
 0x18e   : > { %901 = vrot.lane.b32.xlu1 %v4078_v56, %s3355_s9  ;;  %3216 = vpow2.f32 %v2908_v11  ;;  %3040 = vmatprep.mubr.msk.f32.mxu0 %vm1864_vm11, %v1835_v14  ;;  %v1803_v17 = vsel %vm1787_vm9, %v1770_v35, %v1396_v4  ;;  %v4201_v35 = vld [vmem:[%s3419_s29 + $0x158] sm:$0xff] }
 0x18f   : > { %775 = vrot.lane.b32.xlu0 %v2862_v53, %s3353_s30  ;;  %3218 = vpow2.f32 %v2907_v61 }
 0x190   : > { %v4122_v62 = vpop.permute.xlu1 %1015 }
 0x191   : > { %v4124_v2 = vpop.permute.xlu0 %633 }
 0x192   : > { %1409 = vrot.lane.b32.xlu1 %v2831_v18, %s3359_s21 }
 0x193   : > { %1283 = vrot.lane.b32.xlu0 %v4118_v25, %s3358_s12 }
 0x194   : > { %v1524_v20 = vpop.permute.xlu1 %1523 }
 0x195   : > { %v1142_v9 = vpop.permute.xlu0 %1141  ;;  %v1836_v33 = vsel %vm1820_vm10, %v1803_v17, %v1524_v20 }
 0x196   : > { %1029 = vrot.lane.b32.xlu1 %v2831_v18, %s3356_s10  ;;  %3041 = vmatmul.mubr.msk.f32.gmra.mrb[14].mxu0 %vm1864_vm11, %v1836_v33  ;;  %v1738_v51 = vsel %vm1721_vm7, %v1705_v16, %v1142_v9 }
 0x197   : > { %903 = vrot.lane.b32.xlu0 %v4118_v25, %s3355_s9 }
 0x198   : > { %v4141_v44 = vpop.permute.xlu1 %761  ;;  %v3217_v36 = vpop.eup %3216 }
 0x199   : > { %v4143_v12 = vpop.permute.xlu0 %635  ;;  %v3219_v24 = vpop.eup %3218  ;;  %v2287_v38 = vadd.f32 1.0, %v3217_v36  ;;  %v2834_v36 = vld [vmem:[%s3419_s29 + $0x159] sm:$0xff] }
 0x19a   : > { %1537 = vrot.lane.b32.xlu1 %v2863_v37, %s3361_s22  ;;  %v2286_v39 = vadd.f32 1.0, %v3219_v24 }
 0x19b   : > { %1411 = vrot.lane.b32.xlu0 %v2832_v21, %s3359_s21  ;;  %3220 = vrcp.f32 %v2287_v38 }
 0x19c   : > { %v1270_v45 = vpop.permute.xlu1 %1269  ;;  %3222 = vrcp.f32 %v2286_v39 }
 0x19d   : > { %v1144_v48 = vpop.permute.xlu0 %1143  ;;  %v1771_v54 = vsel %vm1754_vm8, %v1738_v51, %v1270_v45 }
 0x19e   : > { %1031 = vrot.lane.b32.xlu1 %v2832_v21, %s3356_s10 }
 0x19f   : > { %649 = vrot.lane.b32.xlu0 %v2831_v18, %s3354_s8  ;;  %v1607_v18 = vsel %vm1589_vm3, %v3761_v46, %v4057_v5 }
 0x1a0   : > { %v4150_v43 = vpop.permute.xlu1 %889  ;;  %v1640_v31 = vsel %vm1622_vm4, %v1607_v18, %v4066_v41 }
 0x1a1   : > { %v4152_v53 = vpop.permute.xlu0 %763  ;;  %v1673_v17 = vsel %vm1655_vm5, %v1640_v31, %v4084_v63 }
 0x1a2   : > { %1539 = vrot.lane.b32.xlu1 %v2864_v40, %s3361_s22  ;;  %v1706_v20 = vsel %vm1688_vm6, %v1673_v17, %v4122_v62  ;;  %v2865_v62 = vld [vmem:[%s3419_s29 + $0x152] sm:$0xff]  ;;  %v1609_v17 = vsel %vm1589_vm3, %v3829_v26, %v4143_v12 }
 0x1a3   : > { %1157 = vrot.lane.b32.xlu0 %v2863_v37, %s3357_s11  ;;  %v1739_v41 = vsel %vm1721_vm7, %v1706_v20, %v1144_v48 }
 0x1a4   : > { %v1398_v59 = vpop.permute.xlu1 %1397 }
 0x1a5   : > { %v1272_v34 = vpop.permute.xlu0 %1271  ;;  %v3221_v28 = vpop.eup %3220  ;;  %v1804_v60 = vsel %vm1787_vm9, %v1771_v54, %v1398_v59 }
 0x1a6   : > { %777 = vrot.lane.b32.xlu1 %v2863_v37, %s3353_s30  ;;  %v3223_v57 = vpop.eup %3222  ;;  %v2383_v55 = vmul.f32 %v3221_v28, %v4098_v7  ;;  %v1772_v9 = vsel %vm1754_vm8, %v1739_v41, %v1272_v34  ;;  %v2866_v28 = vld [vmem:[%s3419_s29 + $0x15a] sm:$0xff]  ;;  %v1642_v41 = vsel %vm1622_vm4, %v1609_v17, %v4152_v53 }
 0x1a7   : > { %651 = vrot.lane.b32.xlu0 %v2832_v21, %s3354_s8  ;;  %v2382_v8 = vmul.f32 %v3223_v57, %v4102_v50 }
 0x1a8   : > { %v4170_v13 = vpop.permute.xlu1 %1017 }
 0x1a9   : > { %v4172_v27 = vpop.permute.xlu0 %891  ;;  %v4176_v22 = vadd.f32 %v2383_v55, %v2382_v8  ;;  %v3024_v4 = vpop.f32.mrb[2].mxu0  ;;  %v1608_v8 = vsel %vm1589_vm3, %v3804_v0, %v4124_v2 }
 0x1aa   : > { %1285 = vrot.lane.b32.xlu1 %v4165_v3, %s3358_s12  ;;  %v4184_v7 = vadd.f32 %v3024_v4, %v4089_v47  ;;  %v2041_v50 = vpop.f32.mrb[3].mxu0  ;;  %v1641_v51 = vsel %vm1622_vm4, %v1608_v8, %v4141_v44  ;;  %v4247_v4 = vld [vmem:[%s3419_s29 + $0x168] sm:$0xff]  ;;  %v2868_v8 = vld [vmem:[%s3419_s29 + $0x172] sm:$0xff] }
 0x1ab   : > { %1159 = vrot.lane.b32.xlu0 %v2864_v40, %s3357_s11  ;;  %v2042_v11 = vadd.f32 %v4089_v47, %v2041_v50  ;;  %v1674_v54 = vsel %vm1655_vm5, %v1641_v51, %v4150_v43 }
 0x1ac   : > { %v1526_v14 = vpop.permute.xlu1 %1525  ;;  %v2910_v61 = vmul.f32 -1.442695, %v4184_v7  ;;  %v1707_v0 = vsel %vm1688_vm6, %v1674_v54, %v4170_v13 }
 0x1ad   : > { %v1400_v23 = vpop.permute.xlu0 %1399  ;;  %v1837_v30 = vsel %vm1820_vm10, %v1804_v60, %v1526_v14  ;;  %v2909_v29 = vmul.f32 -1.442695, %v2042_v11 }
 0x1ae   : > { %905 = vrot.lane.b32.xlu1 %v4165_v3, %s3355_s9  ;;  %3224 = vpow2.f32 %v2910_v61  ;;  %3043 = vmatprep.mubr.msk.f32.mxu0 %vm1864_vm11, %v1837_v30  ;;  %v1805_v63 = vsel %vm1787_vm9, %v1772_v9, %v1400_v23  ;;  %v2835_v9 = vld [vmem:[%s3419_s29 + $0x169] sm:$0xff] }
 0x1af   : > { %779 = vrot.lane.b32.xlu0 %v2864_v40, %s3353_s30  ;;  %3226 = vpow2.f32 %v2909_v29 }
 0x1b0   : > { %v4205_v46 = vpop.permute.xlu1 %1019 }
 0x1b1   : > { %v4207_v5 = vpop.permute.xlu0 %637 }
 0x1b2   : > { %1413 = vrot.lane.b32.xlu1 %v2833_v58, %s3359_s21 }
 0x1b3   : > { %1287 = vrot.lane.b32.xlu0 %v4201_v35, %s3358_s12 }
 0x1b4   : > { %v1528_v33 = vpop.permute.xlu1 %1527 }
 0x1b5   : > { %v1146_v37 = vpop.permute.xlu0 %1145  ;;  %v1838_v21 = vsel %vm1820_vm10, %v1805_v63, %v1528_v33  ;;  %v4287_v63 = vld [vmem:[%s3419_s29 + $0x170] sm:$0xff]  ;;  %v1675_v33 = vsel %vm1655_vm5, %v1642_v41, %v4172_v27 }
 0x1b6   : > { %1033 = vrot.lane.b32.xlu1 %v2833_v58, %s3356_s10  ;;  %3044 = vmatmul.mubr.msk.f32.gmra.mrb[16].mxu0 %vm1864_vm11, %v1838_v21  ;;  %v1740_v61 = vsel %vm1721_vm7, %v1707_v0, %v1146_v37  ;;  %v1708_v37 = vsel %vm1688_vm6, %v1675_v33, %v4205_v46  ;;  %v2867_v46 = vld [vmem:[%s3419_s29 + $0x16a] sm:$0xff] }
 0x1b7   : > { %907 = vrot.lane.b32.xlu0 %v4201_v35, %s3355_s9 }
 0x1b8   : > { %v4224_v24 = vpop.permute.xlu1 %765  ;;  %v3225_v39 = vpop.eup %3224 }
 0x1b9   : > { %v4226_v38 = vpop.permute.xlu0 %639  ;;  %v3227_v45 = vpop.eup %3226  ;;  %v2289_v48 = vadd.f32 1.0, %v3225_v39 }
 0x1ba   : > { %1541 = vrot.lane.b32.xlu1 %v2865_v62, %s3361_s22  ;;  %v2288_v40 = vadd.f32 1.0, %v3227_v45  ;;  %v2836_v45 = vld [vmem:[%s3419_s29 + $0x171] sm:$0xff]  ;;  %v1611_v33 = vsel %vm1589_vm3, %v3897_v6, %v4226_v38 }
 0x1bb   : > { %1415 = vrot.lane.b32.xlu0 %v2834_v36, %s3359_s21  ;;  %3228 = vrcp.f32 %v2289_v48 }
 0x1bc   : > { %v1274_v59 = vpop.permute.xlu1 %1273  ;;  %3230 = vrcp.f32 %v2288_v40 }
 0x1bd   : > { %v1148_v34 = vpop.permute.xlu0 %1147  ;;  %v1773_v43 = vsel %vm1754_vm8, %v1740_v61, %v1274_v59 }
 0x1be   : > { %1035 = vrot.lane.b32.xlu1 %v2834_v36, %s3356_s10  ;;  %v1741_v53 = vsel %vm1721_vm7, %v1708_v37, %v1148_v34 }
 0x1bf   : > { %653 = vrot.lane.b32.xlu0 %v2833_v58, %s3354_s8 }
 0x1c0   : > { %v4233_v15 = vpop.permute.xlu1 %893 }
 0x1c1   : > { %v4235_v57 = vpop.permute.xlu0 %767 }
 0x1c2   : > { %1543 = vrot.lane.b32.xlu1 %v2866_v28, %s3361_s22 }
 0x1c3   : > { %1161 = vrot.lane.b32.xlu0 %v2865_v62, %s3357_s11 }
 0x1c4   : > { %v1402_v42 = vpop.permute.xlu1 %1401 }
 0x1c5   : > { %v1276_v55 = vpop.permute.xlu0 %1275  ;;  %v3229_v1 = vpop.eup %3228  ;;  %v1806_v13 = vsel %vm1787_vm9, %v1773_v43, %v1402_v42 }
 0x1c6   : > { %781 = vrot.lane.b32.xlu1 %v2865_v62, %s3353_s30  ;;  %v3231_v16 = vpop.eup %3230  ;;  %v2385_v2 = vmul.f32 %v3229_v1, %v4184_v7  ;;  %v1774_v21 = vsel %vm1754_vm8, %v1741_v53, %v1276_v55  ;;  %v1644_v53 = vsel %vm1622_vm4, %v1611_v33, %v4235_v57 }
 0x1c7   : > { %655 = vrot.lane.b32.xlu0 %v2834_v36, %s3354_s8  ;;  %v2384_v50 = vmul.f32 %v3231_v16, %v2042_v11 }
 0x1c8   : > { %v4251_v60 = vpop.permute.xlu1 %1021 }
 0x1c9   : > { %v4253_v14 = vpop.permute.xlu0 %895  ;;  %v2415_v23 = vadd.f32 %v4176_v22, %v2384_v50  ;;  %v3027_v44 = vpop.f32.mrb[4].mxu0 }
 0x1ca   : > { %1289 = vrot.lane.b32.xlu1 %v4247_v4, %s3358_s12  ;;  %v4265_v11 = vadd.f32 %v3027_v44, %v4089_v47  ;;  %v2051_v30 = vpop.f32.mrb[5].mxu0  ;;  %v2805_v44 = vld [vmem:[%s3419_s29 + $0x180] sm:$0xff] }
 0x1cb   : > { %1163 = vrot.lane.b32.xlu0 %v2866_v28, %s3357_s11  ;;  %v4269_v22 = vadd.f32 %v4089_v47, %v2051_v30  ;;  %v4271_v7 = vadd.f32 %v2415_v23, %v2385_v2  ;;  %v1610_v2 = vsel %vm1589_vm3, %v3872_v52, %v4207_v5 }
 0x1cc   : > { %v1530_v18 = vpop.permute.xlu1 %1529  ;;  %v2912_v31 = vmul.f32 -1.442695, %v4265_v11  ;;  %v1643_v61 = vsel %vm1622_vm4, %v1610_v2, %v4224_v24  ;;  %v2776_v2 = vld [vmem:[%s3419_s29 + $0x18a] sm:$0xff] }
 0x1cd   : > { %v1404_v29 = vpop.permute.xlu0 %1403  ;;  %v1839_v58 = vsel %vm1820_vm10, %v1806_v13, %v1530_v18  ;;  %v2911_v20 = vmul.f32 -1.442695, %v4269_v22  ;;  %v1676_v43 = vsel %vm1655_vm5, %v1643_v61, %v4233_v15 }
 0x1ce   : > { %909 = vrot.lane.b32.xlu1 %v4247_v4, %s3355_s9  ;;  %3232 = vpow2.f32 %v2912_v31  ;;  %3046 = vmatprep.mubr.msk.f32.mxu0 %vm1864_vm11, %v1839_v58  ;;  %v1807_v27 = vsel %vm1787_vm9, %v1774_v21, %v1404_v29  ;;  %v1709_v52 = vsel %vm1688_vm6, %v1676_v43, %v4251_v60  ;;  %v2837_v21 = vld [vmem:[%s3419_s29 + $0x181] sm:$0xff]  ;;  %v2807_v43 = vld [vmem:[%s3419_s29 + $0x198] sm:$0xff] }
 0x1cf   : > { %783 = vrot.lane.b32.xlu0 %v2866_v28, %s3353_s30  ;;  %3234 = vpow2.f32 %v2911_v20 }
 0x1d0   : > { %v4291_v26 = vpop.permute.xlu1 %1023 }
 0x1d1   : > { %v4293_v12 = vpop.permute.xlu0 %641 }
 0x1d2   : > { %1417 = vrot.lane.b32.xlu1 %v2835_v9, %s3359_s21 }
 0x1d3   : > { %1291 = vrot.lane.b32.xlu0 %v4287_v63, %s3358_s12 }
 0x1d4   : > { %v1532_v62 = vpop.permute.xlu1 %1531 }
 0x1d5   : > { %v1150_v36 = vpop.permute.xlu0 %1149  ;;  %v1840_v39 = vsel %vm1820_vm10, %v1807_v27, %v1532_v62  ;;  %v2806_v27 = vld [vmem:[%s3419_s29 + $0x188] sm:$0xff]  ;;  %v1677_v62 = vsel %vm1655_vm5, %v1644_v53, %v4253_v14 }
 0x1d6   : > { %1037 = vrot.lane.b32.xlu1 %v2835_v9, %s3356_s10  ;;  %3047 = vmatmul.mubr.msk.f32.gmra.mrb[18].mxu0 %vm1864_vm11, %v1840_v39  ;;  %v1742_v31 = vsel %vm1721_vm7, %v1709_v52, %v1150_v36  ;;  %v1710_v36 = vsel %vm1688_vm6, %v1677_v62, %v4291_v26  ;;  %v2869_v26 = vld [vmem:[%s3419_s29 + $0x182] sm:$0xff] }
 0x1d7   : > { %911 = vrot.lane.b32.xlu0 %v4287_v63, %s3355_s9  ;;  %v2872_v53 = vld [vmem:[%s3419_s29 + $0x1a2] sm:$0xff] }
 0x1d8   : > { %v4310_v48 = vpop.permute.xlu1 %769  ;;  %v3233_v59 = vpop.eup %3232 }
 0x1d9   : > { %v4312_v40 = vpop.permute.xlu0 %643  ;;  %v3235_v34 = vpop.eup %3234  ;;  %v2291_v28 = vadd.f32 1.0, %v3233_v59 }
 0x1da   : > { %1545 = vrot.lane.b32.xlu1 %v2867_v46, %s3361_s22  ;;  %v2290_v42 = vadd.f32 1.0, %v3235_v34  ;;  %v2838_v34 = vld [vmem:[%s3419_s29 + $0x189] sm:$0xff] }
 0x1db   : > { %1419 = vrot.lane.b32.xlu0 %v2836_v45, %s3359_s21  ;;  %3236 = vrcp.f32 %v2291_v28 }
 0x1dc   : > { %v1278_v55 = vpop.permute.xlu1 %1277  ;;  %3238 = vrcp.f32 %v2290_v42 }
 0x1dd   : > { %v1152_v1 = vpop.permute.xlu0 %1151  ;;  %v1775_v15 = vsel %vm1754_vm8, %v1742_v31, %v1278_v55 }
 0x1de   : > { %1039 = vrot.lane.b32.xlu1 %v2836_v45, %s3356_s10  ;;  %v1743_v57 = vsel %vm1721_vm7, %v1710_v36, %v1152_v1 }
 0x1df   : > { %657 = vrot.lane.b32.xlu0 %v2835_v9, %s3354_s8 }
 0x1e0   : > { %v4319_v16 = vpop.permute.xlu1 %897 }
 0x1e1   : > { %v4321_v51 = vpop.permute.xlu0 %771 }
 0x1e2   : > { %1547 = vrot.lane.b32.xlu1 %v2868_v8, %s3361_s22 }
 0x1e3   : > { %1165 = vrot.lane.b32.xlu0 %v2867_v46, %s3357_s11 }
 0x1e4   : > { %v1406_v54 = vpop.permute.xlu1 %1405 }
 0x1e5   : > { %v1280_v50 = vpop.permute.xlu0 %1279  ;;  %v3237_v0 = vpop.eup %3236  ;;  %v1808_v60 = vsel %vm1787_vm9, %v1775_v15, %v1406_v54  ;;  %v2840_v15 = vld [vmem:[%s3419_s29 + $0x1a1] sm:$0xff] }
 0x1e6   : > { %785 = vrot.lane.b32.xlu1 %v2867_v46, %s3353_s30  ;;  %v3239_v23 = vpop.eup %3238  ;;  %v2387_v5 = vmul.f32 %v3237_v0, %v4265_v11  ;;  %v1776_v39 = vsel %vm1754_vm8, %v1743_v57, %v1280_v50 }
 0x1e7   : > { %659 = vrot.lane.b32.xlu0 %v2836_v45, %s3354_s8  ;;  %v2386_v30 = vmul.f32 %v3239_v23, %v4269_v22 }
 0x1e8   : > { %v4336_v13 = vpop.permute.xlu1 %1025 }
 0x1e9   : > { %v4338_v18 = vpop.permute.xlu0 %899  ;;  %v2417_v29 = vadd.f32 %v4271_v7, %v2386_v30  ;;  %v3030_v24 = vpop.f32.mrb[6].mxu0 }
 0x1ea   : > { %1293 = vrot.lane.b32.xlu1 %v2805_v44, %s3358_s12  ;;  %v4349_v22 = vadd.f32 %v3030_v24, %v4089_v47  ;;  %v2061_v58 = vpop.f32.mrb[7].mxu0 }
 0x1eb   : > { %1167 = vrot.lane.b32.xlu0 %v2868_v8, %s3357_s11  ;;  %v4353_v11 = vadd.f32 %v4089_v47, %v2061_v58  ;;  %v4355_v7 = vadd.f32 %v2417_v29, %v2387_v5  ;;  %v1612_v29 = vsel %vm1589_vm3, %v3940_v32, %v4293_v12  ;;  %v2839_v58 = vld [vmem:[%s3419_s29 + $0x199] sm:$0xff] }
 0x1ec   : > { %v1534_v17 = vpop.permute.xlu1 %1533  ;;  %v2914_v41 = vmul.f32 -1.442695, %v4349_v22  ;;  %v1645_v24 = vsel %vm1622_vm4, %v1612_v29, %v4310_v48 }
 0x1ed   : > { %v1408_v20 = vpop.permute.xlu0 %1407  ;;  %v1841_v9 = vsel %vm1820_vm10, %v1808_v60, %v1534_v17  ;;  %v2913_v37 = vmul.f32 -1.442695, %v4353_v11  ;;  %v1678_v60 = vsel %vm1655_vm5, %v1645_v24, %v4319_v16 }
 0x1ee   : > { %913 = vrot.lane.b32.xlu1 %v2805_v44, %s3355_s9  ;;  %3240 = vpow2.f32 %v2914_v41  ;;  %3049 = vmatprep.mubr.msk.f32.mxu0 %vm1864_vm11, %v1841_v9  ;;  %v1809_v14 = vsel %vm1787_vm9, %v1776_v39, %v1408_v20  ;;  %v2808_v44 = vld [vmem:[%s3419_s29 + $0x1a0] sm:$0xff]  ;;  %v1711_v12 = vsel %vm1688_vm6, %v1678_v60, %v4336_v13  ;;  %v1613_v39 = vsel %vm1589_vm3, %v3965_v49, %v4312_v40 }
 0x1ef   : > { %787 = vrot.lane.b32.xlu0 %v2868_v8, %s3353_s30  ;;  %3242 = vpow2.f32 %v2913_v37 }
 0x1f0   : > { %v4372_v6 = vpop.permute.xlu1 %1027 }
 0x1f1   : > { %v4374_v38 = vpop.permute.xlu0 %645 }
 0x1f2   : > { %1421 = vrot.lane.b32.xlu1 %v2837_v21, %s3359_s21  ;;  %v1614_v24 = vsel %vm1589_vm3, %v4008_v10, %v4374_v38 }
 0x1f3   : > { %1295 = vrot.lane.b32.xlu0 %v2806_v27, %s3358_s12 }
 0x1f4   : > { %v1536_v46 = vpop.permute.xlu1 %1535 }
 0x1f5   : > { %v1154_v45 = vpop.permute.xlu0 %1153  ;;  %v1842_v59 = vsel %vm1820_vm10, %v1809_v14, %v1536_v46  ;;  %v1646_v46 = vsel %vm1622_vm4, %v1613_v39, %v4321_v51 }
 0x1f6   : > { %1041 = vrot.lane.b32.xlu1 %v2837_v21, %s3356_s10  ;;  %3050 = vmatmul.mubr.msk.f32.gmra.mrb[20].mxu0 %vm1864_vm11, %v1842_v59  ;;  %v1744_v9 = vsel %vm1721_vm7, %v1711_v12, %v1154_v45  ;;  %v2871_v21 = vld [vmem:[%s3419_s29 + $0x19a] sm:$0xff]  ;;  %v1679_v45 = vsel %vm1655_vm5, %v1646_v46, %v4338_v18 }
 0x1f7   : > { %915 = vrot.lane.b32.xlu0 %v2806_v27, %s3355_s9  ;;  %v1712_v49 = vsel %vm1688_vm6, %v1679_v45, %v4372_v6 }
 0x1f8   : > { %v4389_v28 = vpop.permute.xlu1 %773  ;;  %v3241_v55 = vpop.eup %3240 }
 0x1f9   : > { %v4391_v42 = vpop.permute.xlu0 %647  ;;  %v3243_v1 = vpop.eup %3242  ;;  %v2293_v8 = vadd.f32 1.0, %v3241_v55 }
 0x1fa   : > { %1549 = vrot.lane.b32.xlu1 %v2869_v26, %s3361_s22  ;;  %v2292_v54 = vadd.f32 1.0, %v3243_v1 }
 0x1fb   : > { %1423 = vrot.lane.b32.xlu0 %v2838_v34, %s3359_s21  ;;  %3244 = vrcp.f32 %v2293_v8 }
 0x1fc   : > { %v1282_v50 = vpop.permute.xlu1 %1281  ;;  %3246 = vrcp.f32 %v2292_v54 }
 0x1fd   : > { %v1156_v0 = vpop.permute.xlu0 %1155  ;;  %v1777_v16 = vsel %vm1754_vm8, %v1744_v9, %v1282_v50 }
 0x1fe   : > { %1169 = vrot.lane.b32.xlu1 %v2869_v26, %s3357_s11  ;;  %v1745_v40 = vsel %vm1721_vm7, %v1712_v49, %v1156_v0 }
 0x1ff   : > { %1043 = vrot.lane.b32.xlu0 %v2838_v34, %s3356_s10 }
 0x200   : > { %v4398_v23 = vpop.permute.xlu1 %901 }
 0x201   : > { %v4400_v61 = vpop.permute.xlu0 %775 }
 0x202   : > { %1171 = vrot.lane.b32.xlu1 %v2776_v2, %s3357_s11 }
 0x203   : > { %1551 = vrot.lane.b32.xlu0 %v2776_v2, %s3361_s22 }
 0x204   : > { %v1410_v30 = vpop.permute.xlu1 %1409 }
 0x205   : > { %v1284_v52 = vpop.permute.xlu0 %1283  ;;  %v3245_v5 = vpop.eup %3244  ;;  %v1810_v13 = vsel %vm1787_vm9, %v1777_v16, %v1410_v30 }
 0x206   : > { %1299 = vrot.lane.b32.xlu1 %v2808_v44, %s3358_s12  ;;  %v3247_v31 = vpop.eup %3246  ;;  %v2389_v41 = vmul.f32 %v3245_v5, %v4349_v22  ;;  %v1778_v34 = vsel %vm1754_vm8, %v1745_v40, %v1284_v52 }
 0x207   : > { %1297 = vrot.lane.b32.xlu0 %v2807_v43, %s3358_s12  ;;  %v2388_v17 = vmul.f32 %v3247_v31, %v4353_v11 }
 0x208   : > { %v4418_v20 = vpop.permute.xlu1 %1029 }
 0x209   : > { %v4420_v32 = vpop.permute.xlu0 %903  ;;  %v2419_v48 = vadd.f32 %v4355_v7, %v2388_v17  ;;  %v3033_v33 = vpop.f32.mrb[8].mxu0 }
 0x20a   : > { %1427 = vrot.lane.b32.xlu1 %v2840_v15, %s3359_s21  ;;  %v2077_v11 = vadd.f32 %v3033_v33, %v4089_v47  ;;  %v2071_v37 = vpop.f32.mrb[9].mxu0 }
 0x20b   : > { %1425 = vrot.lane.b32.xlu0 %v2839_v58, %s3359_s21  ;;  %v2072_v22 = vadd.f32 %v4089_v47, %v2071_v37  ;;  %v2420_v27 = vadd.f32 %v2419_v48, %v2389_v41  ;;  %v1647_v58 = vsel %vm1622_vm4, %v1614_v24, %v4389_v28 }
 0x20c   : > { %v1538_v7 = vpop.permute.xlu1 %1537  ;;  %v2916_v36 = vmul.f32 -1.442695, %v2077_v11  ;;  %v1680_v60 = vsel %vm1655_vm5, %v1647_v58, %v4398_v23 }
 0x20d   : > { %v1412_v62 = vpop.permute.xlu0 %1411  ;;  %v1843_v57 = vsel %vm1820_vm10, %v1810_v13, %v1538_v7  ;;  %v2915_v14 = vmul.f32 -1.442695, %v2072_v22  ;;  %v1713_v48 = vsel %vm1688_vm6, %v1680_v60, %v4418_v20 }
 0x20e   : > { %1555 = vrot.lane.b32.xlu1 %v2872_v53, %s3361_s22  ;;  %3248 = vpow2.f32 %v2916_v36  ;;  %3052 = vmatprep.mubr.msk.f32.mxu0 %vm1864_vm11, %v1843_v57  ;;  %v1811_v55 = vsel %vm1787_vm9, %v1778_v34, %v1412_v62 }
 0x20f   : > { %1553 = vrot.lane.b32.xlu0 %v2871_v21, %s3361_s22  ;;  %3250 = vpow2.f32 %v2915_v14 }
 0x210   : > { %v1032_v59 = vpop.permute.xlu1 %1031 }
 0x211   : > { %v4446_v26 = vpop.permute.xlu0 %649 }
 0x214   : > { %v1540_v51 = vpop.permute.xlu1 %1539 }
 0x215   : > { %v1158_v1 = vpop.permute.xlu0 %1157  ;;  %v1844_v8 = vsel %vm1820_vm10, %v1811_v55, %v1540_v51 }
 0x216   : > { %3053 = vmatmul.mubr.msk.f32.gmra.mrb[22].mxu0 %vm1864_vm11, %v1844_v8  ;;  %v1746_v16 = vsel %vm1721_vm7, %v1713_v48, %v1158_v1 }
 0x218   : > { %v4455_v18 = vpop.permute.xlu1 %777  ;;  %v3249_v50 = vpop.eup %3248 }
 0x219   : > { %v4457_v54 = vpop.permute.xlu0 %651  ;;  %v3251_v2 = vpop.eup %3250  ;;  %v2295_v44 = vadd.f32 1.0, %v3249_v50 }
 0x21a   : > { %v2294_v6 = vadd.f32 1.0, %v3251_v2 }
 0x21b   : > { %3252 = vrcp.f32 %v2295_v44 }
 0x21c   : > { %v1286_v0 = vpop.permute.xlu1 %1285  ;;  %3254 = vrcp.f32 %v2294_v6 }
 0x21d   : > { %v1160_v43 = vpop.permute.xlu0 %1159  ;;  %v1779_v10 = vsel %vm1754_vm8, %v1746_v16, %v1286_v0 }
 0x220   : > { %v4459_v30 = vpop.permute.xlu1 %905 }
 0x221   : > { %v4461_v52 = vpop.permute.xlu0 %779 }
 0x224   : > { %v1414_v5 = vpop.permute.xlu1 %1413 }
 0x225   : > { %v1288_v29 = vpop.permute.xlu0 %1287  ;;  %v3253_v31 = vpop.eup %3252  ;;  %v1812_v53 = vsel %vm1787_vm9, %v1779_v10, %v1414_v5 }
 0x226   : > { %v3255_v15 = vpop.eup %3254  ;;  %v2391_v9 = vmul.f32 %v3253_v31, %v2077_v11  ;;  %v1615_v11 = vsel %vm1589_vm3, %v4033_v19, %v4391_v42 }
 0x227   : > { %v2390_v17 = vmul.f32 %v3255_v15, %v2072_v22  ;;  %v1648_v62 = vsel %vm1622_vm4, %v1615_v11, %v4400_v61 }
 0x228   : > { %v1034_v12 = vpop.permute.xlu1 %1033  ;;  %v1681_v36 = vsel %vm1655_vm5, %v1648_v62, %v4420_v32 }
 0x229   : > { %v4470_v41 = vpop.permute.xlu0 %907  ;;  %v2421_v33 = vadd.f32 %v2420_v27, %v2390_v17  ;;  %v3036_v37 = vpop.f32.mrb[10].mxu0  ;;  %v1714_v14 = vsel %vm1688_vm6, %v1681_v36, %v1032_v59 }
 0x22a   : > { %v2087_v38 = vadd.f32 %v3036_v37, %v4089_v47  ;;  %v2081_v28 = vpop.f32.mrb[11].mxu0  ;;  %v1747_v46 = vsel %vm1721_vm7, %v1714_v14, %v1160_v43  ;;  %v1616_v43 = vsel %vm1589_vm3, %v4078_v56, %v4446_v26 }
 0x22b   : > { %v2082_v23 = vadd.f32 %v4089_v47, %v2081_v28  ;;  %v2422_v21 = vadd.f32 %v2421_v33, %v2391_v9  ;;  %v1780_v19 = vsel %vm1754_vm8, %v1747_v46, %v1288_v29  ;;  %v1649_v29 = vsel %vm1622_vm4, %v1616_v43, %v4455_v18 }
 0x22c   : > { %v1542_v13 = vpop.permute.xlu1 %1541  ;;  %v2918_v7 = vmul.f32 -1.442695, %v2087_v38  ;;  %v1682_v31 = vsel %vm1655_vm5, %v1649_v29, %v4459_v30 }
 0x22d   : > { %v1416_v22 = vpop.permute.xlu0 %1415  ;;  %v1845_v20 = vsel %vm1820_vm10, %v1812_v53, %v1542_v13  ;;  %v2917_v27 = vmul.f32 -1.442695, %v2082_v23  ;;  %v1715_v60 = vsel %vm1688_vm6, %v1682_v31, %v1034_v12 }
 0x22e   : > { %3055 = vmatprep.mubr.msk.f32.mxu0 %vm1864_vm11, %v1845_v20  ;;  %3256 = vpow2.f32 %v2918_v7  ;;  %v1813_v42 = vsel %vm1787_vm9, %v1780_v19, %v1416_v22 }
 0x22f   : > { %3258 = vpow2.f32 %v2917_v27 }
 0x230   : > { %v1036_v57 = vpop.permute.xlu1 %1035 }
 0x231   : > { %v4488_v39 = vpop.permute.xlu0 %653 }
 0x234   : > { %v1544_v45 = vpop.permute.xlu1 %1543 }
 0x235   : > { %v1162_v49 = vpop.permute.xlu0 %1161  ;;  %v1846_v61 = vsel %vm1820_vm10, %v1813_v42, %v1544_v45 }
 0x236   : > { %3056 = vmatmul.mubr.msk.f32.gmra.mrb[24].mxu0 %vm1864_vm11, %v1846_v61  ;;  %v1748_v9 = vsel %vm1721_vm7, %v1715_v60, %v1162_v49 }
 0x238   : > { %v4496_v40 = vpop.permute.xlu1 %781  ;;  %v3257_v34 = vpop.eup %3256 }
 0x239   : > { %v4498_v32 = vpop.permute.xlu0 %655  ;;  %v3259_v55 = vpop.eup %3258  ;;  %v2297_v51 = vadd.f32 1.0, %v3257_v34 }
 0x23a   : > { %v2296_v59 = vadd.f32 1.0, %v3259_v55 }
 0x23b   : > { %3260 = vrcp.f32 %v2297_v51 }
 0x23c   : > { %v1290_v1 = vpop.permute.xlu1 %1289  ;;  %3262 = vrcp.f32 %v2296_v59  ;;  %v1618_v59 = vsel %vm1589_vm3, %v4165_v3, %v4488_v39 }
 0x23d   : > { %v1164_v8 = vpop.permute.xlu0 %1163  ;;  %v1781_v56 = vsel %vm1754_vm8, %v1748_v9, %v1290_v1 }
 0x240   : > { %v4500_v50 = vpop.permute.xlu1 %909 }
 0x241   : > { %v4502_v2 = vpop.permute.xlu0 %783 }
 0x244   : > { %v1418_v44 = vpop.permute.xlu1 %1417 }
 0x245   : > { %v1292_v6 = vpop.permute.xlu0 %1291  ;;  %v3261_v0 = vpop.eup %3260  ;;  %v1814_v18 = vsel %vm1787_vm9, %v1781_v56, %v1418_v44 }
 0x246   : > { %v3263_v5 = vpop.eup %3262  ;;  %v2393_v17 = vmul.f32 %v3261_v0, %v2087_v38  ;;  %v1617_v38 = vsel %vm1589_vm3, %v4118_v25, %v4457_v54 }
 0x247   : > { %v2392_v24 = vmul.f32 %v3263_v5, %v2082_v23 }
 0x248   : > { %v1038_v15 = vpop.permute.xlu1 %1037 }
 0x249   : > { %v4511_v58 = vpop.permute.xlu0 %911  ;;  %v2423_v48 = vadd.f32 %v2422_v21, %v2392_v24  ;;  %v3039_v33 = vpop.f32.mrb[12].mxu0  ;;  %v1650_v21 = vsel %vm1622_vm4, %v1617_v38, %v4461_v52 }
 0x24a   : > { %v2097_v26 = vadd.f32 %v3039_v33, %v4089_v47  ;;  %v2091_v16 = vpop.f32.mrb[13].mxu0  ;;  %v1683_v13 = vsel %vm1655_vm5, %v1650_v21, %v4470_v41 }
 0x24b   : > { %v2092_v30 = vadd.f32 %v4089_v47, %v2091_v16  ;;  %v2424_v37 = vadd.f32 %v2423_v48, %v2393_v17  ;;  %v1716_v20 = vsel %vm1688_vm6, %v1683_v13, %v1036_v57 }
 0x24c   : > { %v1546_v10 = vpop.permute.xlu1 %1545  ;;  %v2920_v53 = vmul.f32 -1.442695, %v2097_v26  ;;  %v1749_v11 = vsel %vm1721_vm7, %v1716_v20, %v1164_v8  ;;  %v1651_v8 = vsel %vm1622_vm4, %v1618_v59, %v4496_v40 }
 0x24d   : > { %v1420_v28 = vpop.permute.xlu0 %1419  ;;  %v1847_v12 = vsel %vm1820_vm10, %v1814_v18, %v1546_v10  ;;  %v2919_v23 = vmul.f32 -1.442695, %v2092_v30  ;;  %v1782_v25 = vsel %vm1754_vm8, %v1749_v11, %v1292_v6  ;;  %v1684_v44 = vsel %vm1655_vm5, %v1651_v8, %v4500_v50 }
 0x24e   : > { %3058 = vmatprep.mubr.msk.f32.mxu0 %vm1864_vm11, %v1847_v12  ;;  %3264 = vpow2.f32 %v2920_v53  ;;  %v1815_v54 = vsel %vm1787_vm9, %v1782_v25, %v1420_v28  ;;  %v1717_v5 = vsel %vm1688_vm6, %v1684_v44, %v1038_v15  ;;  %v4588_v44 = vld [vmem:[%s4737_s2] ss:$0 sm:$0xff] }
 0x24f   : > { %3266 = vpow2.f32 %v2919_v23 }
 0x250   : > { %v1040_v22 = vpop.permute.xlu1 %1039 }
 0x251   : > { %v4528_v7 = vpop.permute.xlu0 %657 }
 0x252   : > { %v1620_v13 = vsel %vm1589_vm3, %v4247_v4, %v4528_v7 }
 0x254   : > { %v1548_v27 = vpop.permute.xlu1 %1547 }
 0x255   : > { %v1166_v62 = vpop.permute.xlu0 %1165  ;;  %v1848_v52 = vsel %vm1820_vm10, %v1815_v54, %v1548_v27 }
 0x256   : > { %3059 = vmatmul.mubr.msk.f32.gmra.mrb[26].mxu0 %vm1864_vm11, %v1848_v52  ;;  %v1750_v24 = vsel %vm1721_vm7, %v1717_v5, %v1166_v62 }
 0x258   : > { %v786_v36 = vpop.permute.xlu1 %785  ;;  %v3265_v14 = vpop.eup %3264 }
 0x259   : > { %v660_v41 = vpop.permute.xlu0 %659  ;;  %v3267_v46 = vpop.eup %3266  ;;  %v2299_v19 = vadd.f32 1.0, %v3265_v14  ;;  %v1653_v11 = vsel %vm1622_vm4, %v1620_v13, %v786_v36 }
 0x25a   : > { %v2298_v42 = vadd.f32 1.0, %v3267_v46 }
 0x25b   : > { %3268 = vrcp.f32 %v2299_v19 }
 0x25c   : > { %v1294_v57 = vpop.permute.xlu1 %1293  ;;  %3270 = vrcp.f32 %v2298_v42 }
 0x25d   : > { %v1168_v45 = vpop.permute.xlu0 %1167  ;;  %v1783_v17 = vsel %vm1754_vm8, %v1750_v24, %v1294_v57 }
 0x260   : > { %v914_v49 = vpop.permute.xlu1 %913 }
 0x261   : > { %v788_v61 = vpop.permute.xlu0 %787  ;;  %v1686_v27 = vsel %vm1655_vm5, %v1653_v11, %v914_v49 }
 0x264   : > { %v1422_v34 = vpop.permute.xlu1 %1421 }
 0x265   : > { %v1296_v55 = vpop.permute.xlu0 %1295  ;;  %v3269_v51 = vpop.eup %3268  ;;  %v1816_v40 = vsel %vm1787_vm9, %v1783_v17, %v1422_v34 }
 0x266   : > { %v3271_v1 = vpop.eup %3270  ;;  %v2395_v29 = vmul.f32 %v3269_v51, %v2097_v26  ;;  %v1619_v26 = vsel %vm1589_vm3, %v4201_v35, %v4498_v32 }
 0x267   : > { %v2394_v6 = vmul.f32 %v3271_v1, %v2092_v30  ;;  %v1652_v18 = vsel %vm1622_vm4, %v1619_v26, %v4502_v2 }
 0x268   : > { %v1042_v0 = vpop.permute.xlu1 %1041 }
 0x269   : > { %v916_v43 = vpop.permute.xlu0 %915  ;;  %v2425_v31 = vadd.f32 %v2424_v37, %v2394_v6  ;;  %v3042_v60 = vpop.f32.mrb[14].mxu0  ;;  %v1719_v46 = vsel %vm1688_vm6, %v1686_v27, %v1042_v0 }
 0x26a   : > { %v2107_v3 = vadd.f32 %v3042_v60, %v4089_v47  ;;  %v2101_v39 = vpop.f32.mrb[15].mxu0 }
 0x26b   : > { %v2102_v48 = vadd.f32 %v4089_v47, %v2101_v39  ;;  %v2426_v50 = vadd.f32 %v2425_v31, %v2395_v29  ;;  %v1685_v47 = vsel %vm1655_vm5, %v1652_v18, %v4511_v58 }
 0x26c   : > { %v1550_v9 = vpop.permute.xlu1 %1549  ;;  %v2922_v56 = vmul.f32 -1.442695, %v2107_v3  ;;  %v1718_v10 = vsel %vm1688_vm6, %v1685_v47, %v1040_v22  ;;  %v1621_v22 = vsel %vm1589_vm3, %v4287_v63, %v660_v41 }
 0x26d   : > { %v1424_v33 = vpop.permute.xlu0 %1423  ;;  %v1849_v15 = vsel %vm1820_vm10, %v1816_v40, %v1550_v9  ;;  %v2921_v16 = vmul.f32 -1.442695, %v2102_v48  ;;  %v1751_v28 = vsel %vm1721_vm7, %v1718_v10, %v1168_v45  ;;  %v1654_v25 = vsel %vm1622_vm4, %v1621_v22, %v788_v61 }
 0x26e   : > { %3061 = vmatprep.mubr.msk.f32.mxu0 %vm1864_vm11, %v1849_v15  ;;  %3272 = vpow2.f32 %v2922_v56  ;;  %v1784_v53 = vsel %vm1754_vm8, %v1751_v28, %v1296_v55  ;;  %v1687_v62 = vsel %vm1655_vm5, %v1654_v25, %v916_v43 }
 0x26f   : > { %3274 = vpow2.f32 %v2921_v16  ;;  %v1817_v35 = vsel %vm1787_vm9, %v1784_v53, %v1424_v33 }
 0x270   : > { %v1170_v30 = vpop.permute.xlu1 %1169 }
 0x271   : > { %v1044_v37 = vpop.permute.xlu0 %1043  ;;  %v1752_v63 = vsel %vm1721_vm7, %v1719_v46, %v1170_v30  ;;  %v2452_v46 = vld [vmem:[%s4738_s3] sm:$0xff] }
 0x272   : > { %v1720_v4 = vsel %vm1688_vm6, %v1687_v62, %v1044_v37 }
 0x274   : > { %v1172_v32 = vpop.permute.xlu1 %1171 }
 0x275   : > { %v1552_v12 = vpop.permute.xlu0 %1551  ;;  %v1753_v7 = vsel %vm1721_vm7, %v1720_v4, %v1172_v32  ;;  %v2453_v4 = vld [vmem:[%s4738_s3 + $0x8] sm:$0xff] }
 0x276   : > { %v1850_v38 = vsel %vm1820_vm10, %v1817_v35, %v1552_v12 }
 0x277   : > { %3062 = vmatmul.mubr.msk.f32.gmra.mrb[28].mxu0 %vm1864_vm11, %v1850_v38 }
 0x278   : > { %v1300_v2 = vpop.permute.xlu1 %1299  ;;  %v3273_v58 = vpop.eup %3272 }
 0x279   : > { %v1298_v23 = vpop.permute.xlu0 %1297  ;;  %v3275_v21 = vpop.eup %3274  ;;  %v2301_v20 = vadd.f32 1.0, %v3273_v58  ;;  %v1786_v36 = vsel %vm1754_vm8, %v1753_v7, %v1300_v2  ;;  %v3148_v7 = vpack.c.bf16 %v2453_v4, %v2452_v46 }
 0x27a   : > { %v2300_v54 = vadd.f32 1.0, %v3275_v21  ;;  %v1785_v41 = vsel %vm1754_vm8, %v1752_v63, %v1298_v23 }
 0x27b   : > { %3276 = vrcp.f32 %v2301_v20 }
 0x27c   : > { %v1428_v52 = vpop.permute.xlu1 %1427  ;;  %3278 = vrcp.f32 %v2300_v54 }
 0x27d   : > { %v1426_v14 = vpop.permute.xlu0 %1425  ;;  %v1819_v19 = vsel %vm1787_vm9, %v1786_v36, %v1428_v52 }
 0x27e   : > { %v1818_v42 = vsel %vm1787_vm9, %v1785_v41, %v1426_v14 }
 0x280   : > { %v1556_v57 = vpop.permute.xlu1 %1555 }
 0x281   : > { %v1554_v45 = vpop.permute.xlu0 %1553  ;;  %v1852_v49 = vsel %vm1820_vm10, %v1819_v19, %v1556_v57  ;;  %v3362_v57 = vmov 0.0|0.0  }
 0x282   : > { %v1851_v61 = vsel %vm1820_vm10, %v1818_v42, %v1554_v45  ;;  %3147 = vmatprep.subr.bf16.mxu1 %v3362_v57 }
 0x283   : > { %3064 = vmatprep.mubr.msk.f32.mxu0 %vm1864_vm11, %v1851_v61  ;;  %3149 = vmatpush3.bf16.msra.mxu1 %v3148_v7 }
 0x284   : > { %3065 = vmatmul.mubr.msk.f32.gmra.mrb[30].mxu0 %vm1864_vm11, %v1852_v49  ;;  %3150 = vmatprep.subr.bf16.mxu1 %v3362_v57 }
 0x285   : > { %v3277_v34 = vpop.eup %3276 }
 0x286   : > { %v3279_v55 = vpop.eup %3278  ;;  %v2397_v59 = vmul.f32 %v3277_v34, %v2107_v3  ;;  %v2454_v34 = vld [vmem:[%s4738_s3 + $0x10] sm:$0xff] }
 0x287   : > { %v2396_v51 = vmul.f32 %v3279_v55, %v2102_v48  ;;  %v2455_v55 = vld [vmem:[%s4738_s3 + $0x18] sm:$0xff] }
 0x289   : > { %v2427_v1 = vadd.f32 %v2426_v50, %v2396_v51  ;;  %v3045_v8 = vpop.f32.mrb[16].mxu0 }
 0x28a   : > { %v2117_v6 = vadd.f32 %v4588_v44, %v3045_v8  ;;  %v2111_v0 = vpop.f32.mrb[17].mxu0  ;;  %v2457_v8 = vld [vmem:[%s4738_s3 + $0x28] sm:$0xff] }
 0x28b   : > { %v2112_v43 = vadd.f32 %v4588_v44, %v2111_v0  ;;  %v2428_v5 = vadd.f32 %v2427_v1, %v2397_v59  ;;  %v3151_v59 = vpack.c.bf16 %v2455_v55, %v2454_v34  ;;  %v2456_v1 = vld [vmem:[%s4738_s3 + $0x20] sm:$0xff]  ;;  %v2458_v0 = vld [vmem:[%s4738_s3 + $0x30] sm:$0xff] }
 0x28c   : > { %v2924_v29 = vmul.f32 -1.442695, %v2117_v6 }
 0x28d   : > { %v2923_v31 = vmul.f32 -1.442695, %v2112_v43  ;;  %3152 = vmatpush3.bf16.msra.mxu1 %v3151_v59 }
 0x28e   : > { %3280 = vpow2.f32 %v2924_v29  ;;  %3153 = vmatprep.subr.bf16.mxu1 %v3362_v57 }
 0x28f   : > { %3282 = vpow2.f32 %v2923_v31  ;;  %v2460_v31 = vld [vmem:[%s4738_s3 + $0x40] sm:$0xff] }
 0x298   : > { %v3281_v24 = vpop.eup %3280 }
 0x299   : > { %v3283_v60 = vpop.eup %3282  ;;  %v2303_v17 = vadd.f32 1.0, %v3281_v24  ;;  %v2461_v24 = vld [vmem:[%s4738_s3 + $0x48] sm:$0xff] }
 0x29a   : > { %v2302_v3 = vadd.f32 1.0, %v3283_v60 }
 0x29b   : > { %3284 = vrcp.f32 %v2303_v17 }
 0x29c   : > { %3286 = vrcp.f32 %v2302_v3  ;;  %v3160_v3 = vpack.c.bf16 %v2461_v24, %v2460_v31 }
 0x2a5   : > { %v3285_v39 = vpop.eup %3284 }
 0x2a6   : > { %v3287_v40 = vpop.eup %3286  ;;  %v2399_v50 = vmul.f32 %v3285_v39, %v2117_v6  ;;  %v3154_v6 = vpack.c.bf16 %v2457_v8, %v2456_v1 }
 0x2a7   : > { %v2398_v48 = vmul.f32 %v3287_v40, %v2112_v43  ;;  %v2459_v43 = vld [vmem:[%s4738_s3 + $0x38] sm:$0xff]  ;;  %v2462_v40 = vld [vmem:[%s4738_s3 + $0x50] sm:$0xff] }
 0x2a8   : > { %3155 = vmatpush3.bf16.msra.mxu1 %v3154_v6 }
 0x2a9   : > { %v2429_v9 = vadd.f32 %v2428_v5, %v2398_v48  ;;  %v3048_v33 = vpop.f32.mrb[18].mxu0  ;;  %3156 = vmatprep.subr.bf16.mxu1 %v3362_v57  ;;  %v3157_v5 = vpack.c.bf16 %v2459_v43, %v2458_v0  ;;  %v2463_v48 = vld [vmem:[%s4738_s3 + $0x58] sm:$0xff] }
 0x2aa   : > { %v2127_v56 = vadd.f32 %v4588_v44, %v3048_v33  ;;  %v2121_v15 = vpop.f32.mrb[19].mxu0  ;;  %v2465_v33 = vld [vmem:[%s4738_s3 + $0x68] sm:$0xff] }
 0x2ab   : > { %v2122_v26 = vadd.f32 %v4588_v44, %v2121_v15  ;;  %v2430_v16 = vadd.f32 %v2429_v9, %v2399_v50  ;;  %v2464_v50 = vld [vmem:[%s4738_s3 + $0x60] sm:$0xff]  ;;  %v3163_v9 = vpack.c.bf16 %v2463_v48, %v2462_v40 }
 0x2ac   : > { %v2926_v18 = vmul.f32 -1.442695, %v2127_v56  ;;  %3158 = vmatpush3.bf16.msra.mxu1 %v3157_v5  ;;  %v3166_v15 = vpack.c.bf16 %v2465_v33, %v2464_v50 }
 0x2ad   : > { %v2925_v47 = vmul.f32 -1.442695, %v2122_v26  ;;  %3159 = vmatprep.subr.bf16.mxu1 %v3362_v57 }
 0x2ae   : > { %3288 = vpow2.f32 %v2926_v18 }
 0x2af   : > { %3290 = vpow2.f32 %v2925_v47 }
 0x2b0   : > { %3161 = vmatpush3.bf16.msra.mxu1 %v3160_v3 }
 0x2b1   : > { %3162 = vmatprep.subr.bf16.mxu1 %v3362_v57 }
 0x2b4   : > { %3164 = vmatpush3.bf16.msra.mxu1 %v3163_v9 }
 0x2b5   : > { %3165 = vmatprep.subr.bf16.mxu1 %v3362_v57 }
 0x2b8   : > { %v3289_v30 = vpop.eup %3288  ;;  %3167 = vmatpush3.bf16.msra.mxu1 %v3166_v15 }
 0x2b9   : > { %v3291_v37 = vpop.eup %3290  ;;  %v2305_v10 = vadd.f32 1.0, %v3289_v30  ;;  %3168 = vmatprep.subr.bf16.mxu1 %v3362_v57 }
 0x2ba   : > { %v2304_v28 = vadd.f32 1.0, %v3291_v37 }
 0x2bb   : > { %3292 = vrcp.f32 %v2305_v10 }
 0x2bc   : > { %3294 = vrcp.f32 %v2304_v28 }
 0x2c5   : > { %v3293_v53 = vpop.eup %3292 }
 0x2c6   : > { %v3295_v35 = vpop.eup %3294  ;;  %v2401_v12 = vmul.f32 %v3293_v53, %v2127_v56  ;;  %v3364_v56 = vmov 0.0  }
 0x2c7   : > { %v2400_v32 = vmul.f32 %v3295_v35, %v2122_v26  ;;  %3099 = vmatprep.mubr.msk.f32.mxu1 %vm3363_vm12, %v3364_v56  ;;  %v2466_v26 = vld [vmem:[%s4738_s3 + $0x70] sm:$0xff] }
 0x2c9   : > { %v2431_v38 = vadd.f32 %v2430_v16, %v2400_v32  ;;  %v3051_v2 = vpop.f32.mrb[20].mxu0  ;;  %v2467_v16 = vld [vmem:[%s4738_s3 + $0x78] sm:$0xff] }
 0x2ca   : > { %v2137_v23 = vadd.f32 %v4588_v44, %v3051_v2  ;;  %v2131_v58 = vpop.f32.mrb[21].mxu0  ;;  %v3169_v18 = vpack.c.bf16 %v2467_v16, %v2466_v26 }
 0x2cb   : > { %v2132_v21 = vadd.f32 %v4588_v44, %v2131_v58  ;;  %v2432_v13 = vadd.f32 %v2431_v38, %v2401_v12 }
 0x2cc   : > { %v2928_v22 = vmul.f32 -1.442695, %v2137_v23  ;;  %3170 = vmatpush3.bf16.msra.mxu1 %v3169_v18 }
 0x2cd   : > { %v2927_v20 = vmul.f32 -1.442695, %v2132_v21  ;;  %3171 = vmatprep.subr.bf16.mxu1 %v3362_v57 }
 0x2ce   : > { %3296 = vpow2.f32 %v2928_v22 }
 0x2cf   : > { %3298 = vpow2.f32 %v2927_v20 }
 0x2d8   : > { %v3297_v11 = vpop.eup %3296 }
 0x2d9   : > { %v3299_v25 = vpop.eup %3298  ;;  %v2307_v54 = vadd.f32 1.0, %v3297_v11 }
 0x2da   : > { %v2306_v27 = vadd.f32 1.0, %v3299_v25 }
 0x2db   : > { %3300 = vrcp.f32 %v2307_v54 }
 0x2dc   : > { %3302 = vrcp.f32 %v2306_v27 }
 0x2e5   : > { %v3301_v62 = vpop.eup %3300 }
 0x2e6   : > { %v3303_v52 = vpop.eup %3302  ;;  %v2403_v36 = vmul.f32 %v3301_v62, %v2137_v23 }
 0x2e7   : > { %v2402_v14 = vmul.f32 %v3303_v52, %v2132_v21 }
 0x2e9   : > { %v3054_v63 = vpop.f32.mrb[22].mxu0  ;;  %v2433_v41 = vadd.f32 %v2432_v13, %v2402_v14 }
 0x2ea   : > { %v2147_v19 = vadd.f32 %v4588_v44, %v3054_v63  ;;  %v2141_v42 = vpop.f32.mrb[23].mxu0 }
 0x2eb   : > { %v2142_v45 = vadd.f32 %v4588_v44, %v2141_v42  ;;  %v2434_v61 = vadd.f32 %v2433_v41, %v2403_v36 }
 0x2ec   : > { %v2930_v49 = vmul.f32 -1.442695, %v2147_v19 }
 0x2ed   : > { %v2929_v51 = vmul.f32 -1.442695, %v2142_v45 }
 0x2ee   : > { %3304 = vpow2.f32 %v2930_v49 }
 0x2ef   : > { %3306 = vpow2.f32 %v2929_v51 }
 0x2f8   : > { %v3305_v29 = vpop.eup %3304 }
 0x2f9   : > { %v3307_v60 = vpop.eup %3306  ;;  %v2309_v17 = vadd.f32 1.0, %v3305_v29 }
 0x2fa   : > { %v2308_v39 = vadd.f32 1.0, %v3307_v60 }
 0x2fb   : > { %3308 = vrcp.f32 %v2309_v17 }
 0x2fc   : > { %3310 = vrcp.f32 %v2308_v39 }
 0x305   : > { %v3309_v47 = vpop.eup %3308 }
 0x306   : > { %v3311_v30 = vpop.eup %3310  ;;  %v2405_v10 = vmul.f32 %v3309_v47, %v2147_v19 }
 0x307   : > { %v2404_v37 = vmul.f32 %v3311_v30, %v2142_v45 }
 0x309   : > { %v2435_v28 = vadd.f32 %v2434_v61, %v2404_v37  ;;  %v3057_v53 = vpop.f32.mrb[24].mxu0 }
 0x30a   : > { %v2157_v35 = vadd.f32 %v4588_v44, %v3057_v53  ;;  %v2151_v32 = vpop.f32.mrb[25].mxu0 }
 0x30b   : > { %v2152_v12 = vadd.f32 %v4588_v44, %v2151_v32  ;;  %v2436_v38 = vadd.f32 %v2435_v28, %v2405_v10 }
 0x30c   : > { %v2932_v2 = vmul.f32 -1.442695, %v2157_v35 }
 0x30d   : > { %v2931_v23 = vmul.f32 -1.442695, %v2152_v12 }
 0x30e   : > { %3312 = vpow2.f32 %v2932_v2 }
 0x30f   : > { %3314 = vpow2.f32 %v2931_v23 }
 0x318   : > { %v3313_v58 = vpop.eup %3312 }
 0x319   : > { %v3315_v21 = vpop.eup %3314  ;;  %v2311_v13 = vadd.f32 1.0, %v3313_v58 }
 0x31a   : > { %v2310_v22 = vadd.f32 1.0, %v3315_v21  ;;  %v2540_v21 = vld [vmem:[%s4740_s5] sm:$0xff] }
 0x31b   : > { %3316 = vrcp.f32 %v2311_v13  ;;  %v2541_v13 = vld [vmem:[%s4740_s5 + $0x8] sm:$0xff] }
 0x31c   : > { %3318 = vrcp.f32 %v2310_v22 }
 0x325   : > { %v3317_v20 = vpop.eup %3316 }
 0x326   : > { %v3319_v11 = vpop.eup %3318  ;;  %v2407_v54 = vmul.f32 %v3317_v20, %v2157_v35  ;;  %v3172_v20 = vpack.c.bf16 %v2541_v13, %v2540_v21 }
 0x327   : > { %v2406_v25 = vmul.f32 %v3319_v11, %v2152_v12 }
 0x329   : > { %v2437_v27 = vadd.f32 %v2436_v38, %v2406_v25  ;;  %v3060_v62 = vpop.f32.mrb[26].mxu0  ;;  %v2542_v25 = vld [vmem:[%s4740_s5 + $0x10] sm:$0xff] }
 0x32a   : > { %v2167_v52 = vadd.f32 %v4588_v44, %v3060_v62  ;;  %v2161_v14 = vpop.f32.mrb[27].mxu0  ;;  %v2544_v62 = vld [vmem:[%s4740_s5 + $0x20] sm:$0xff] }
 0x32b   : > { %v2162_v46 = vadd.f32 %v4588_v44, %v2161_v14  ;;  %v2438_v4 = vadd.f32 %v2437_v27, %v2407_v54  ;;  %v2543_v54 = vld [vmem:[%s4740_s5 + $0x18] sm:$0xff] }
 0x32c   : > { %v2934_v63 = vmul.f32 -1.442695, %v2167_v52  ;;  %v3175_v27 = vpack.c.bf16 %v2543_v54, %v2542_v25 }
 0x32d   : > { %v2933_v7 = vmul.f32 -1.442695, %v2162_v46 }
 0x32e   : > { %3320 = vpow2.f32 %v2934_v63  ;;  %v2548_v63 = vld [vmem:[%s4740_s5 + $0x40] sm:$0xff] }
 0x32f   : > { %3322 = vpow2.f32 %v2933_v7  ;;  %v2549_v7 = vld [vmem:[%s4740_s5 + $0x48] sm:$0xff] }
 0x338   : > { %v3321_v36 = vpop.eup %3320 }
 0x339   : > { %v3323_v41 = vpop.eup %3322  ;;  %v2313_v19 = vadd.f32 1.0, %v3321_v36  ;;  %v3184_v36 = vpack.c.bf16 %v2549_v7, %v2548_v63 }
 0x33a   : > { %v2312_v42 = vadd.f32 1.0, %v3323_v41  ;;  %v2550_v41 = vld [vmem:[%s4740_s5 + $0x50] sm:$0xff] }
 0x33b   : > { %3324 = vrcp.f32 %v2313_v19  ;;  %v2551_v19 = vld [vmem:[%s4740_s5 + $0x58] sm:$0xff] }
 0x33c   : > { %3326 = vrcp.f32 %v2312_v42  ;;  %v3187_v42 = vpack.c.bf16 %v2551_v19, %v2550_v41 }
 0x345   : > { %v3325_v45 = vpop.eup %3324 }
 0x346   : > { %v3327_v49 = vpop.eup %3326  ;;  %v2409_v34 = vmul.f32 %v3325_v45, %v2167_v52  ;;  %v2545_v52 = vld [vmem:[%s4740_s5 + $0x28] sm:$0xff]  ;;  %v2552_v45 = vld [vmem:[%s4740_s5 + $0x60] sm:$0xff] }
 0x347   : > { %v2408_v61 = vmul.f32 %v3327_v49, %v2162_v46  ;;  %v3178_v14 = vpack.c.bf16 %v2545_v52, %v2544_v62  ;;  %v2546_v46 = vld [vmem:[%s4740_s5 + $0x30] sm:$0xff]  ;;  %v2553_v49 = vld [vmem:[%s4740_s5 + $0x68] sm:$0xff] }
 0x349   : > { %v2439_v55 = vadd.f32 %v2438_v4, %v2408_v61  ;;  %v3190_v61 = vpack.c.bf16 %v2553_v49, %v2552_v45 }
 0x34a   : > { %v3063_v51 = vpop.f32.mrb[28].mxu0 }
 0x34b   : > { %v2177_v59 = vadd.f32 %v4588_v44, %v3063_v51  ;;  %v2171_v1 = vpop.f32.mrb[29].mxu0  ;;  %v2440_v6 = vadd.f32 %v2439_v55, %v2409_v34  ;;  %v2554_v34 = vld [vmem:[%s4740_s5 + $0x70] sm:$0xff]  ;;  %v2555_v55 = vld [vmem:[%s4740_s5 + $0x78] sm:$0xff] }
 0x34c   : > { %v2172_v8 = vadd.f32 %v4588_v44, %v2171_v1  ;;  %v3193_v51 = vpack.c.bf16 %v2555_v55, %v2554_v34 }
 0x34d   : > { %v2936_v0 = vmul.f32 -1.442695, %v2177_v59 }
 0x34e   : > { %v2935_v43 = vmul.f32 -1.442695, %v2172_v8 }
 0x34f   : > { %3328 = vpow2.f32 %v2936_v0 }
 0x350   : > { %3330 = vpow2.f32 %v2935_v43 }
 0x357   : > { %v3066_v5 = vpop.f32.mrb[30].mxu0 }
 0x358   : > { %v2187_v29 = vadd.f32 %v4588_v44, %v3066_v5  ;;  %v2181_v31 = vpop.f32.mrb[31].mxu0 }
 0x359   : > { %v3329_v24 = vpop.eup %3328  ;;  %v2182_v60 = vadd.f32 %v4588_v44, %v2181_v31 }
 0x35a   : > { %v3331_v17 = vpop.eup %3330  ;;  %v2315_v3 = vadd.f32 1.0, %v3329_v24  ;;  %v2938_v39 = vmul.f32 -1.442695, %v2187_v29 }
 0x35b   : > { %v2314_v40 = vadd.f32 1.0, %v3331_v17  ;;  %v2937_v48 = vmul.f32 -1.442695, %v2182_v60 }
 0x35c   : > { %3332 = vrcp.f32 %v2315_v3 }
 0x35d   : > { %3334 = vrcp.f32 %v2314_v40 }
 0x35e   : > { %3336 = vpow2.f32 %v2938_v39 }
 0x35f   : > { %3338 = vpow2.f32 %v2937_v48 }
 0x366   : > { %v3333_v50 = vpop.eup %3332 }
 0x367   : > { %v3335_v9 = vpop.eup %3334  ;;  %v2411_v18 = vmul.f32 %v3333_v50, %v2177_v59  ;;  %v2468_v59 = vld [vmem:[%s4739_s4] sm:$0x1] }
 0x368   : > { %v3337_v33 = vpop.eup %3336  ;;  %v2410_v15 = vmul.f32 %v3335_v9, %v2172_v8 }
 0x369   : > { %v3339_v26 = vpop.eup %3338  ;;  %v2317_v16 = vadd.f32 1.0, %v3337_v33 }
 0x36a   : > { %v2441_v47 = vadd.f32 %v2440_v6, %v2410_v15  ;;  %v2316_v30 = vadd.f32 1.0, %v3339_v26 }
 0x36b   : > { %3340 = vrcp.f32 %v2317_v16 }
 0x36c   : > { %3342 = vrcp.f32 %v2316_v30  ;;  %v2442_v44 = vadd.f32 %v2441_v47, %v2411_v18 }
 0x375   : > { %v3341_v37 = vpop.eup %3340 }
 0x376   : > { %v3343_v10 = vpop.eup %3342  ;;  %v2413_v53 = vmul.f32 %v3341_v37, %v2187_v29 }
 0x377   : > { %v2412_v28 = vmul.f32 %v3343_v10, %v2182_v60 }
 0x379   : > { %v2443_v35 = vadd.f32 %v2442_v44, %v2412_v28 }
 0x37b   : > { %v2444_v32 = vadd.f32 %v2443_v35, %v2413_v53 }
 0x37d   : > { %v2445_v12 = vrot.slane %v2444_v32, 4 }
 0x37f   : > { %v2446_v38 = vadd.f32 %v2445_v12, %v2444_v32 }
 0x381   : > { %v2447_v2 = vrot.slane %v2446_v38, 2 }
 0x383   : > { %v2448_v23 = vadd.f32 %v2447_v2, %v2446_v38 }
 0x385   : > { %v2449_v58 = vrot.slane %v2448_v23, 1 }
 0x387   : > { %v2450_v22 = vadd.f32 %v2449_v58, %v2448_v23 }
 0x389   : > { %v2451_v11 = vmul.f32 0.00390625, %v2450_v22 }
 0x38b   : > { %3100 = vmatmul.mubr.f32.vlgmr.msra.gmra.mrb[0].mxu1 %v2451_v11 }
 0x38c   : > { %3173 = vmatpush3.bf16.msra.mxu1 %v3172_v20  ;;  %3134 = vmatprep.mubr.msk.f32.mxu1 %vm3363_vm12, %v3364_v56  ;;  %v2547_v56 = vld [vmem:[%s4740_s5 + $0x38] sm:$0xff] }
 0x38d   : > { %3174 = vmatprep.subr.bf16.mxu1 %v3362_v57  ;;  %v3181_v4 = vpack.c.bf16 %v2547_v56, %v2546_v46 }
 0x390   : > { %3176 = vmatpush3.bf16.msra.mxu1 %v3175_v27 }
 0x391   : > { %3177 = vmatprep.subr.bf16.mxu1 %v3362_v57 }
 0x394   : > { %3179 = vmatpush3.bf16.msra.mxu1 %v3178_v14 }
 0x395   : > { %3180 = vmatprep.subr.bf16.mxu1 %v3362_v57 }
 0x398   : > { %3182 = vmatpush3.bf16.msra.mxu1 %v3181_v4 }
 0x399   : > { %3183 = vmatprep.subr.bf16.mxu1 %v3362_v57 }
 0x39c   : > { %3185 = vmatpush3.bf16.msra.mxu1 %v3184_v36 }
 0x39d   : > { %3186 = vmatprep.subr.bf16.mxu1 %v3362_v57 }
 0x3a0   : > { %3188 = vmatpush3.bf16.msra.mxu1 %v3187_v42 }
 0x3a1   : > { %3189 = vmatprep.subr.bf16.mxu1 %v3362_v57 }
 0x3a4   : > { %3191 = vmatpush3.bf16.msra.mxu1 %v3190_v61 }
 0x3a5   : > { %3192 = vmatprep.subr.bf16.mxu1 %v3362_v57  ;;  %v2556_v57 = vld [vmem:[%s4741_s6] sm:$0x1] }
 0x3a8   : > { %3194 = vmatpush3.bf16.msra.mxu1 %v3193_v51 }
 0x45e   : > { %v2535_v1 = vpop.f32.mrb[0].mxu1 }
 0x45f   : > { %v2536_v8 = vadd.f32 %v2535_v1, %v2468_v59  ;;  %v3101_v6 = vpop.f32.mrb[1].mxu1 }
 0x461   : > { %v2539_v0 = vmax.f32 %v2536_v8, 0.0 }
 0x463   : > { %3135 = vmatmul.mubr.f32.vlgmr.msra.gmra.mrb[2].mxu1 %v2539_v0 }
 0x536   : > { %v2623_v43 = vpop.f32.mrb[2].mxu1 }
 0x537   : > { %v2624_v5 = vadd.f32 %v2623_v43, %v2556_v57  ;;  %v3136_v29 = vpop.f32.mrb[3].mxu1 }
 0x539   : > { %2627 = vst [vmem:[%s274_s13] sm:$0x1] %v2624_v5 }
 0x53a PF: > { %s17_s24 = sadd.s32 1, %s3351_s24  }
 0x53b   : > { %p14_p4 = scmp.ge.s32.totalorder %s17_s24, 4  }
 0x53d   :  { %16 = sbr.rel (!%p14_p4) target bundleno = 1 (0x1), region = 80 }

</bundles_post_ra>
